<compile_context>
chip_gen: v6e
topology: v6e:2x2x1
jax: 0.10.0
libtpu: 0.0.40
codegen_flags: <defaults>
</compile_context>

<pallas_src>
import functools

import jax
import jax.numpy as jnp
from jax.experimental import pallas as pl
from jax.experimental.pallas import tpu as pltpu


def _round_up(x, m):
    return ((x + m - 1) // m) * m


def _largest_divisor_leq(n, cap):
    cap = max(1, min(n, cap))
    for d in range(cap, 0, -1):
        if n % d == 0:
            return d
    return 1


# ----------------------------------------------------------------------------
# Pallas kernel: one (batch, output-row-tile) step of the fused CoordConv.
# ----------------------------------------------------------------------------
def _coordconv_kernel(x_ref, w_ref, b_ref, o_ref, *, kh, kw, stride, toh, ow, cp):
    """
    x_ref: (Hp, Wp, Cp)      bf16  padded coord-augmented image (VMEM resident)
    w_ref: (KH*KW, Cp, Np)   bf16  per-tap weight slabs (Np % 128 == 0)
    b_ref: (1, Np)           f32   bias row
    o_ref: (toh, OW, Np)     f32   lane-dense output tile
    """
    t = pl.program_id(1)
    row0 = t * (toh * stride)          # first padded-input row for this tile
    mt = toh * ow
    np_ = o_ref.shape[-1]

    acc = jnp.zeros((mt, np_), jnp.float32)
    # Fused im2col: KH*KW shifted slices of the resident image -> accumulating
    # bf16 MXU dots (f32 accumulation).  Statically unrolled (KH*KW is small).
    for i in range(kh):
        for j in range(kw):
            if stride == 1:
                slab = x_ref[pl.ds(row0 + i, toh), pl.ds(j, ow), :]
            else:
                slab = x_ref[pl.ds(row0 + i, toh, stride=stride),
                             pl.ds(j, ow, stride=stride), :]
            a = slab.reshape(mt, cp)                       # (Mt, Cp) bf16
            acc = acc + jnp.dot(a, w_ref[i * kw + j],
                                preferred_element_type=jnp.float32)

    acc = acc + b_ref[...]                                 # broadcast (1, Np)
    o_ref[...] = acc.reshape(toh, ow, np_).astype(o_ref.dtype)


# ----------------------------------------------------------------------------
# Wrapper: coord channels + padding + weight prep + pallas_call
# ----------------------------------------------------------------------------
@functools.partial(jax.jit, static_argnames=("stride", "padding"))
def coord_conv2d(x, weight, bias, *, stride=1, padding=0):
    """
    x:      (B, Cin, H, W)            float32
    weight: (Cout, Cin+2, KH, KW)     float32   (PyTorch OIHW layout)
    bias:   (Cout,)                   float32
    returns (B, Cout, OH, OW)         float32
    """
    b, cin, h, w = x.shape
    cout, cin2, kh, kw = weight.shape
    assert cin2 == cin + 2, "weight must have Cin+2 input channels"

    oh = (h + 2 * padding - kh) // stride + 1
    ow = (w + 2 * padding - kw) // stride + 1
    hp, wp = h + 2 * padding, w + 2 * padding

    cp = _round_up(cin + 2, 8)         # per-tap K, sublane-aligned
    np_ = _round_up(cout, 128)         # lane-dense output channels

    # ---- coord-augmented NHWC input, channel- and spatially-padded, bf16 ----
    xh = jnp.transpose(x, (0, 2, 3, 1))                            # (B,H,W,Cin)
    ch = jnp.linspace(-1.0, 1.0, h, dtype=x.dtype)                 # varies over H
    ch = jnp.broadcast_to(ch[None, :, None, None], (b, h, w, 1))
    cw = jnp.linspace(-1.0, 1.0, w, dtype=x.dtype)                 # varies over W
    cw = jnp.broadcast_to(cw[None, None, :, None], (b, h, w, 1))
    aug = jnp.concatenate([xh, ch, cw], axis=-1)                   # (B,H,W,Cin+2)
    aug = jnp.pad(aug, ((0, 0), (padding, padding), (padding, padding),
                        (0, cp - (cin + 2))))
    xp = aug.astype(jnp.bfloat16)                                  # (B,Hp,Wp,Cp)

    # ---- weight as per-tap (Cp, Np) slabs (bf16), bias as lane-dense f32 row
    wt = jnp.transpose(weight, (2, 3, 1, 0))                       # (KH,KW,Cin+2,Cout)
    wt = jnp.pad(wt, ((0, 0), (0, 0), (0, cp - (cin + 2)), (0, np_ - cout)))
    wt = wt.reshape(kh * kw, cp, np_).astype(jnp.bfloat16)
    bs = jnp.pad(bias, (0, np_ - cout)).reshape(1, np_).astype(jnp.float32)

    # ---- tile plan: whole padded image resident per batch step, tile output
    # rows.  Aim for a large M tile (~<=1024 output pixels) but keep >=2 row
    # tiles when the batch axis alone is small (pipelining / v7x megacore).
    toh = _largest_divisor_leq(oh, max(1, 1024 // max(ow, 1)))
    if oh // toh == 1 and b * (oh // toh) < 4:
        toh = _largest_divisor_leq(oh, max(1, oh // 2))
    n_t = oh // toh

    # TODO(synk): for very large images / Cin, tile the image rows (halo DMA)
    # and add a K grid axis with a VMEM accumulator instead of keeping the
    # whole image and full weight resident in VMEM.
    kernel = functools.partial(_coordconv_kernel, kh=kh, kw=kw, stride=stride,
                               toh=toh, ow=ow, cp=cp)

    out = pl.pallas_call(
        kernel,
        out_shape=jax.ShapeDtypeStruct((b, oh, ow, np_), jnp.float32),
        grid=(b, n_t),
        in_specs=[
            # full padded image, revisited across the row-tile axis
            pl.BlockSpec((None, hp, wp, cp), lambda bi, ti: (bi, 0, 0, 0)),
            # full per-tap weight slabs, resident
            pl.BlockSpec((kh * kw, cp, np_), lambda bi, ti: (0, 0, 0)),
            # bias row
            pl.BlockSpec((1, np_), lambda bi, ti: (0, 0)),
        ],
        out_specs=pl.BlockSpec((None, toh, ow, np_),
                               lambda bi, ti: (bi, ti, 0, 0)),
        compiler_params=pltpu.CompilerParams(
            dimension_semantics=("parallel", "parallel"),
            vmem_limit_bytes=32 * 1024 * 1024),   # fits v7x's smaller VMEM
    )(xp, wt, bs)

    out = out[..., :cout]                       # drop channel padding (lane-dense inside)
    return jnp.transpose(out, (0, 3, 1, 2))     # NCHW, matching the PyTorch module


# ----------------------------------------------------------------------------
# Demo / self-check
# ----------------------------------------------------------------------------
if __name__ == "__main__":
    B, Cin, H, W = 2, 4, 16, 16
    Cout, Ksz, stride, padding = 8, 3, 1, 1

    key = jax.random.PRNGKey(0)
    kx, kw_, kb = jax.random.split(key, 3)

    x = jax.random.normal(kx, (B, Cin, H, W), dtype=jnp.float32)

    # Deterministic Conv2d(in_channels+2, out_channels, k) params.
    fan_in = (Cin + 2) * Ksz * Ksz
    bound = 1.0 / jnp.sqrt(jnp.float32(fan_in))
    weight = jax.random.uniform(kw_, (Cout, Cin + 2, Ksz, Ksz),
                                dtype=jnp.float32, minval=-bound, maxval=bound)
    bias = jax.random.uniform(kb, (Cout,), dtype=jnp.float32,
                              minval=-bound, maxval=bound)

    out = coord_conv2d(x, weight, bias, stride=stride, padding=padding)
    out = jax.block_until_ready(out)

    # Reference: XLA conv on the coord-augmented input.  Inputs are rounded to
    # bf16 to mirror the kernel's bf16 MXU operands (f32 accumulation in both).
    coords_h = jnp.linspace(-1.0, 1.0, H, dtype=jnp.float32)[None, None, :, None]
    coords_h = jnp.broadcast_to(coords_h, (B, 1, H, W))
    coords_w = jnp.linspace(-1.0, 1.0, W, dtype=jnp.float32)[None, None, None, :]
    coords_w = jnp.broadcast_to(coords_w, (B, 1, H, W))
    aug = jnp.concatenate([x, coords_h, coords_w], axis=1)

    ref = jax.lax.conv_general_dilated(
        aug.astype(jnp.bfloat16).astype(jnp.float32),
        weight.astype(jnp.bfloat16).astype(jnp.float32),
        window_strides=(stride, stride),
        padding=[(padding, padding), (padding, padding)],
        dimension_numbers=("NCHW", "OIHW", "NCHW"),
        precision=jax.lax.Precision.HIGHEST) + bias[None, :, None, None]
    ref = jax.block_until_ready(ref)

    assert out.shape == (B, Cout, H, W), out.shape
    max_err = float(jnp.max(jnp.abs(out - ref)))
    assert jnp.allclose(out, ref, atol=2e-3, rtol=2e-3), max_err

    print("KERNEL_OK")
</pallas_src>

<mosaic_0001>
module attributes {stable_mosaic.version = 11 : i64} {
  func.func @_coordconv_kernel(%arg0: i32, %arg1: i32, %arg2: memref<1x18x18x8xbf16, #tpu.memory_space<vmem>>, %arg3: memref<9x8x128xbf16, #tpu.memory_space<vmem>>, %arg4: memref<1x128xf32, #tpu.memory_space<vmem>>, %arg5: memref<1x8x16x128xf32, #tpu.memory_space<vmem>>) attributes {dimension_semantics = [#tpu.dimension_semantics<parallel>, #tpu.dimension_semantics<parallel>], iteration_bounds = array<i64: 2, 2>, scalar_prefetch = 0 : i64, scratch_operands = 0 : i64, tpu.core_type = #tpu.core_type<tc>, window_params = [{transform_indices = @transform_0, window_bounds = array<i64: 1, 18, 18, 8>}, {pipeline_mode = #tpu.pipeline_mode<synchronous>, transform_indices = @transform_1, window_bounds = array<i64: 9, 8, 128>}, {pipeline_mode = #tpu.pipeline_mode<synchronous>, transform_indices = @transform_2, window_bounds = array<i64: 1, 128>}, {transform_indices = @transform_3, window_bounds = array<i64: 1, 8, 16, 128>}]} {
    %c8_i32 = arith.constant 8 : i32
    %0 = arith.muli %arg1, %c8_i32 : i32
    %cst = arith.constant 0.000000e+00 : f32
    %1 = vector.broadcast %cst : f32 to vector<128x128xf32>
    %c0_i32 = arith.constant 0 : i32
    %2 = arith.addi %0, %c0_i32 : i32
    %c0 = arith.constant 0 : index
    %3 = arith.index_cast %2 : i32 to index
    %c0_0 = arith.constant 0 : index
    %c0_1 = arith.constant 0 : index
    %4 = vector.load %arg2[%c0, %3, %c0_0, %c0_1] : memref<1x18x18x8xbf16, #tpu.memory_space<vmem>>, vector<1x8x16x8xbf16>
    %5 = vector.shape_cast %4 : vector<1x8x16x8xbf16> to vector<8x16x8xbf16>
    %6 = vector.shape_cast %5 : vector<8x16x8xbf16> to vector<128x8xbf16>
    %c0_2 = arith.constant 0 : index
    %c0_3 = arith.constant 0 : index
    %c0_4 = arith.constant 0 : index
    %7 = vector.load %arg3[%c0_2, %c0_3, %c0_4] : memref<9x8x128xbf16, #tpu.memory_space<vmem>>, vector<1x8x128xbf16>
    %8 = vector.shape_cast %7 : vector<1x8x128xbf16> to vector<8x128xbf16>
    %cst_5 = arith.constant dense<0.000000e+00> : vector<128x128xf32>
    %9 = tpu.matmul %6, %8, %cst_5 {dimension_numbers = #tpu.dot_dimension_numbers<[1], [0], [0], [1], [0, 0, 1, 1], [], []>} : vector<128x8xbf16>, vector<8x128xbf16>, vector<128x128xf32> -> vector<128x128xf32>
    %10 = arith.addf %1, %9 : vector<128x128xf32>
    %c0_i32_6 = arith.constant 0 : i32
    %11 = arith.addi %0, %c0_i32_6 : i32
    %c0_7 = arith.constant 0 : index
    %12 = arith.index_cast %11 : i32 to index
    %c1 = arith.constant 1 : index
    %c0_8 = arith.constant 0 : index
    %13 = vector.load %arg2[%c0_7, %12, %c1, %c0_8] : memref<1x18x18x8xbf16, #tpu.memory_space<vmem>>, vector<1x8x16x8xbf16>
    %14 = vector.shape_cast %13 : vector<1x8x16x8xbf16> to vector<8x16x8xbf16>
    %15 = vector.shape_cast %14 : vector<8x16x8xbf16> to vector<128x8xbf16>
    %c1_9 = arith.constant 1 : index
    %c0_10 = arith.constant 0 : index
    %c0_11 = arith.constant 0 : index
    %16 = vector.load %arg3[%c1_9, %c0_10, %c0_11] : memref<9x8x128xbf16, #tpu.memory_space<vmem>>, vector<1x8x128xbf16>
    %17 = vector.shape_cast %16 : vector<1x8x128xbf16> to vector<8x128xbf16>
    %cst_12 = arith.constant dense<0.000000e+00> : vector<128x128xf32>
    %18 = tpu.matmul %15, %17, %cst_12 {dimension_numbers = #tpu.dot_dimension_numbers<[1], [0], [0], [1], [0, 0, 1, 1], [], []>} : vector<128x8xbf16>, vector<8x128xbf16>, vector<128x128xf32> -> vector<128x128xf32>
    %19 = arith.addf %10, %18 : vector<128x128xf32>
    %c0_i32_13 = arith.constant 0 : i32
    %20 = arith.addi %0, %c0_i32_13 : i32
    %c0_14 = arith.constant 0 : index
    %21 = arith.index_cast %20 : i32 to index
    %c2 = arith.constant 2 : index
    %c0_15 = arith.constant 0 : index
    %22 = vector.load %arg2[%c0_14, %21, %c2, %c0_15] : memref<1x18x18x8xbf16, #tpu.memory_space<vmem>>, vector<1x8x16x8xbf16>
    %23 = vector.shape_cast %22 : vector<1x8x16x8xbf16> to vector<8x16x8xbf16>
    %24 = vector.shape_cast %23 : vector<8x16x8xbf16> to vector<128x8xbf16>
    %c2_16 = arith.constant 2 : index
    %c0_17 = arith.constant 0 : index
    %c0_18 = arith.constant 0 : index
    %25 = vector.load %arg3[%c2_16, %c0_17, %c0_18] : memref<9x8x128xbf16, #tpu.memory_space<vmem>>, vector<1x8x128xbf16>
    %26 = vector.shape_cast %25 : vector<1x8x128xbf16> to vector<8x128xbf16>
    %cst_19 = arith.constant dense<0.000000e+00> : vector<128x128xf32>
    %27 = tpu.matmul %24, %26, %cst_19 {dimension_numbers = #tpu.dot_dimension_numbers<[1], [0], [0], [1], [0, 0, 1, 1], [], []>} : vector<128x8xbf16>, vector<8x128xbf16>, vector<128x128xf32> -> vector<128x128xf32>
    %28 = arith.addf %19, %27 : vector<128x128xf32>
    %c1_i32 = arith.constant 1 : i32
    %29 = arith.addi %0, %c1_i32 : i32
    %c0_20 = arith.constant 0 : index
    %30 = arith.index_cast %29 : i32 to index
    %c0_21 = arith.constant 0 : index
    %c0_22 = arith.constant 0 : index
    %31 = vector.load %arg2[%c0_20, %30, %c0_21, %c0_22] : memref<1x18x18x8xbf16, #tpu.memory_space<vmem>>, vector<1x8x16x8xbf16>
    %32 = vector.shape_cast %31 : vector<1x8x16x8xbf16> to vector<8x16x8xbf16>
    %33 = vector.shape_cast %32 : vector<8x16x8xbf16> to vector<128x8xbf16>
    %c3 = arith.constant 3 : index
    %c0_23 = arith.constant 0 : index
    %c0_24 = arith.constant 0 : index
    %34 = vector.load %arg3[%c3, %c0_23, %c0_24] : memref<9x8x128xbf16, #tpu.memory_space<vmem>>, vector<1x8x128xbf16>
    %35 = vector.shape_cast %34 : vector<1x8x128xbf16> to vector<8x128xbf16>
    %cst_25 = arith.constant dense<0.000000e+00> : vector<128x128xf32>
    %36 = tpu.matmul %33, %35, %cst_25 {dimension_numbers = #tpu.dot_dimension_numbers<[1], [0], [0], [1], [0, 0, 1, 1], [], []>} : vector<128x8xbf16>, vector<8x128xbf16>, vector<128x128xf32> -> vector<128x128xf32>
    %37 = arith.addf %28, %36 : vector<128x128xf32>
    %c1_i32_26 = arith.constant 1 : i32
    %38 = arith.addi %0, %c1_i32_26 : i32
    %c0_27 = arith.constant 0 : index
    %39 = arith.index_cast %38 : i32 to index
    %c1_28 = arith.constant 1 : index
    %c0_29 = arith.constant 0 : index
    %40 = vector.load %arg2[%c0_27, %39, %c1_28, %c0_29] : memref<1x18x18x8xbf16, #tpu.memory_space<vmem>>, vector<1x8x16x8xbf16>
    %41 = vector.shape_cast %40 : vector<1x8x16x8xbf16> to vector<8x16x8xbf16>
    %42 = vector.shape_cast %41 : vector<8x16x8xbf16> to vector<128x8xbf16>
    %c4 = arith.constant 4 : index
    %c0_30 = arith.constant 0 : index
    %c0_31 = arith.constant 0 : index
    %43 = vector.load %arg3[%c4, %c0_30, %c0_31] : memref<9x8x128xbf16, #tpu.memory_space<vmem>>, vector<1x8x128xbf16>
    %44 = vector.shape_cast %43 : vector<1x8x128xbf16> to vector<8x128xbf16>
    %cst_32 = arith.constant dense<0.000000e+00> : vector<128x128xf32>
    %45 = tpu.matmul %42, %44, %cst_32 {dimension_numbers = #tpu.dot_dimension_numbers<[1], [0], [0], [1], [0, 0, 1, 1], [], []>} : vector<128x8xbf16>, vector<8x128xbf16>, vector<128x128xf32> -> vector<128x128xf32>
    %46 = arith.addf %37, %45 : vector<128x128xf32>
    %c1_i32_33 = arith.constant 1 : i32
    %47 = arith.addi %0, %c1_i32_33 : i32
    %c0_34 = arith.constant 0 : index
    %48 = arith.index_cast %47 : i32 to index
    %c2_35 = arith.constant 2 : index
    %c0_36 = arith.constant 0 : index
    %49 = vector.load %arg2[%c0_34, %48, %c2_35, %c0_36] : memref<1x18x18x8xbf16, #tpu.memory_space<vmem>>, vector<1x8x16x8xbf16>
    %50 = vector.shape_cast %49 : vector<1x8x16x8xbf16> to vector<8x16x8xbf16>
    %51 = vector.shape_cast %50 : vector<8x16x8xbf16> to vector<128x8xbf16>
    %c5 = arith.constant 5 : index
    %c0_37 = arith.constant 0 : index
    %c0_38 = arith.constant 0 : index
    %52 = vector.load %arg3[%c5, %c0_37, %c0_38] : memref<9x8x128xbf16, #tpu.memory_space<vmem>>, vector<1x8x128xbf16>
    %53 = vector.shape_cast %52 : vector<1x8x128xbf16> to vector<8x128xbf16>
    %cst_39 = arith.constant dense<0.000000e+00> : vector<128x128xf32>
    %54 = tpu.matmul %51, %53, %cst_39 {dimension_numbers = #tpu.dot_dimension_numbers<[1], [0], [0], [1], [0, 0, 1, 1], [], []>} : vector<128x8xbf16>, vector<8x128xbf16>, vector<128x128xf32> -> vector<128x128xf32>
    %55 = arith.addf %46, %54 : vector<128x128xf32>
    %c2_i32 = arith.constant 2 : i32
    %56 = arith.addi %0, %c2_i32 : i32
    %c0_40 = arith.constant 0 : index
    %57 = arith.index_cast %56 : i32 to index
    %c0_41 = arith.constant 0 : index
    %c0_42 = arith.constant 0 : index
    %58 = vector.load %arg2[%c0_40, %57, %c0_41, %c0_42] : memref<1x18x18x8xbf16, #tpu.memory_space<vmem>>, vector<1x8x16x8xbf16>
    %59 = vector.shape_cast %58 : vector<1x8x16x8xbf16> to vector<8x16x8xbf16>
    %60 = vector.shape_cast %59 : vector<8x16x8xbf16> to vector<128x8xbf16>
    %c6 = arith.constant 6 : index
    %c0_43 = arith.constant 0 : index
    %c0_44 = arith.constant 0 : index
    %61 = vector.load %arg3[%c6, %c0_43, %c0_44] : memref<9x8x128xbf16, #tpu.memory_space<vmem>>, vector<1x8x128xbf16>
    %62 = vector.shape_cast %61 : vector<1x8x128xbf16> to vector<8x128xbf16>
    %cst_45 = arith.constant dense<0.000000e+00> : vector<128x128xf32>
    %63 = tpu.matmul %60, %62, %cst_45 {dimension_numbers = #tpu.dot_dimension_numbers<[1], [0], [0], [1], [0, 0, 1, 1], [], []>} : vector<128x8xbf16>, vector<8x128xbf16>, vector<128x128xf32> -> vector<128x128xf32>
    %64 = arith.addf %55, %63 : vector<128x128xf32>
    %c2_i32_46 = arith.constant 2 : i32
    %65 = arith.addi %0, %c2_i32_46 : i32
    %c0_47 = arith.constant 0 : index
    %66 = arith.index_cast %65 : i32 to index
    %c1_48 = arith.constant 1 : index
    %c0_49 = arith.constant 0 : index
    %67 = vector.load %arg2[%c0_47, %66, %c1_48, %c0_49] : memref<1x18x18x8xbf16, #tpu.memory_space<vmem>>, vector<1x8x16x8xbf16>
    %68 = vector.shape_cast %67 : vector<1x8x16x8xbf16> to vector<8x16x8xbf16>
    %69 = vector.shape_cast %68 : vector<8x16x8xbf16> to vector<128x8xbf16>
    %c7 = arith.constant 7 : index
    %c0_50 = arith.constant 0 : index
    %c0_51 = arith.constant 0 : index
    %70 = vector.load %arg3[%c7, %c0_50, %c0_51] : memref<9x8x128xbf16, #tpu.memory_space<vmem>>, vector<1x8x128xbf16>
    %71 = vector.shape_cast %70 : vector<1x8x128xbf16> to vector<8x128xbf16>
    %cst_52 = arith.constant dense<0.000000e+00> : vector<128x128xf32>
    %72 = tpu.matmul %69, %71, %cst_52 {dimension_numbers = #tpu.dot_dimension_numbers<[1], [0], [0], [1], [0, 0, 1, 1], [], []>} : vector<128x8xbf16>, vector<8x128xbf16>, vector<128x128xf32> -> vector<128x128xf32>
    %73 = arith.addf %64, %72 : vector<128x128xf32>
    %c2_i32_53 = arith.constant 2 : i32
    %74 = arith.addi %0, %c2_i32_53 : i32
    %c0_54 = arith.constant 0 : index
    %75 = arith.index_cast %74 : i32 to index
    %c2_55 = arith.constant 2 : index
    %c0_56 = arith.constant 0 : index
    %76 = vector.load %arg2[%c0_54, %75, %c2_55, %c0_56] : memref<1x18x18x8xbf16, #tpu.memory_space<vmem>>, vector<1x8x16x8xbf16>
    %77 = vector.shape_cast %76 : vector<1x8x16x8xbf16> to vector<8x16x8xbf16>
    %78 = vector.shape_cast %77 : vector<8x16x8xbf16> to vector<128x8xbf16>
    %c8 = arith.constant 8 : index
    %c0_57 = arith.constant 0 : index
    %c0_58 = arith.constant 0 : index
    %79 = vector.load %arg3[%c8, %c0_57, %c0_58] : memref<9x8x128xbf16, #tpu.memory_space<vmem>>, vector<1x8x128xbf16>
    %80 = vector.shape_cast %79 : vector<1x8x128xbf16> to vector<8x128xbf16>
    %cst_59 = arith.constant dense<0.000000e+00> : vector<128x128xf32>
    %81 = tpu.matmul %78, %80, %cst_59 {dimension_numbers = #tpu.dot_dimension_numbers<[1], [0], [0], [1], [0, 0, 1, 1], [], []>} : vector<128x8xbf16>, vector<8x128xbf16>, vector<128x128xf32> -> vector<128x128xf32>
    %82 = arith.addf %73, %81 : vector<128x128xf32>
    %c0_60 = arith.constant 0 : index
    %c0_61 = arith.constant 0 : index
    %83 = vector.load %arg4[%c0_60, %c0_61] : memref<1x128xf32, #tpu.memory_space<vmem>>, vector<1x128xf32>
    %84 = vector.broadcast %83 : vector<1x128xf32> to vector<128x128xf32>
    %85 = arith.addf %82, %84 : vector<128x128xf32>
    %86 = vector.shape_cast %85 : vector<128x128xf32> to vector<8x16x128xf32>
    %c0_62 = arith.constant 0 : index
    %c0_63 = arith.constant 0 : index
    %c0_64 = arith.constant 0 : index
    %c0_65 = arith.constant 0 : index
    %87 = vector.load %arg5[%c0_62, %c0_63, %c0_64, %c0_65] : memref<1x8x16x128xf32, #tpu.memory_space<vmem>>, vector<1x8x16x128xf32>
    %88 = vector.shape_cast %87 : vector<1x8x16x128xf32> to vector<8x16x128xf32>
    %89 = vector.shape_cast %86 : vector<8x16x128xf32> to vector<1x8x16x128xf32>
    tpu.vector_store %arg5[%c0_62, %c0_63, %c0_64, %c0_65], %89 {strides = array<i32>} : memref<1x8x16x128xf32, #tpu.memory_space<vmem>>, vector<1x8x16x128xf32>,
    return
  }
  func.func @transform_0(%arg0: i32, %arg1: i32) -> (i32, i32, i32, i32) {
    %c0_i32 = arith.constant 0 : i32
    %c0_i32_0 = arith.constant 0 : i32
    %c0_i32_1 = arith.constant 0 : i32
    %c0_i32_2 = arith.constant 0 : i32
    return %arg0, %c0_i32, %c0_i32_0, %c0_i32_1 : i32, i32, i32, i32
  }
  func.func @transform_1(%arg0: i32, %arg1: i32) -> (i32, i32, i32) {
    %c0_i32 = arith.constant 0 : i32
    %c0_i32_0 = arith.constant 0 : i32
    %c0_i32_1 = arith.constant 0 : i32
    %c0_i32_2 = arith.constant 0 : i32
    return %c0_i32, %c0_i32_0, %c0_i32_1 : i32, i32, i32
  }
  func.func @transform_2(%arg0: i32, %arg1: i32) -> (i32, i32) {
    %c0_i32 = arith.constant 0 : i32
    %c0_i32_0 = arith.constant 0 : i32
    %c0_i32_1 = arith.constant 0 : i32
    return %c0_i32, %c0_i32_0 : i32, i32
  }
  func.func @transform_3(%arg0: i32, %arg1: i32) -> (i32, i32, i32, i32) {
    %c0_i32 = arith.constant 0 : i32
    %c0_i32_0 = arith.constant 0 : i32
    %c0_i32_1 = arith.constant 0 : i32
    return %arg0, %arg1, %c0_i32, %c0_i32_0 : i32, i32, i32, i32
  }
}

</mosaic_0001>

<bundles_post_ra>
// kernel: coord_conv2d.1
= control target key start
LH: loop header
LB: loop body
LE: loop exit
PB: predicated region body
PF: predicated region fallthrough
CT: control target
= control target key end

     0   :  { %s3474_s12 = smov 0   ;;  %s3476_s13 = smov 0   ;;  %s4651_s0 = inlined_call_operand.vmem [shape: bf16[2,18,18,8], index: 0, kind: input, shape index: {}]   ;;  %s4652_s1 = inlined_call_operand.vmem [shape: bf16[9,8,128], index: 1, kind: input, shape index: {}]   ;;  %s4653_s2 = inlined_call_operand.vmem [shape: f32[1,128], index: 2, kind: input, shape index: {}]   ;;  %s4654_s3 = inlined_call_operand.vmem [shape: f32[2,16,16,128], index: 3, kind: output, shape index: {}]  }
   0x1   :  { %s3478_s14 = smov 0   ;;  %s3480_s15 = smov 0  }
   0x2   :  { %s3482_s16 = smov 0  }
   0x3 LB: > { %s22_s17 = sadd.s32 1, %s3444_s14  ;;  %s25_s18 = sadd.s32 1, %s3448_s15  ;;  %s3452_s16 = sphi %s3482_s16, %s13_s16   ;;  %s3448_s15 = sphi %s3480_s15, %s4702_s15   ;;  %s3444_s14 = sphi %s3478_s14, %s4701_s14   ;;  %s3440_s13 = sphi %s3476_s13, %s4700_s13   ;;  %s3436_s12 = sphi %s3474_s12, %s4699_s12  }
   0x4   : > { %p23_p0 = scmp.ge.s32.totalorder %s22_s17, 2  ;;  %p2805_p1 = scmp.ge.s32.totalorder %s3452_s16, 1 }
   0x5   : > { %p151_p2 = scmp.lt.s32.totalorder %s3452_s16, 5 }
   0x6   : > { %s4704_s17 = smov (%p23_p0, %s22_s17), 0  ;;  %s4706_s18 = smov (!%p23_p0, %s25_s18), %s3448_s15 }
   0x7   : > { %p152_p3 = pnand %p2805_p1, %p151_p2  ;;  %p27_p4 = scmp.ge.s32.totalorder %s4706_s18, 2 }
   0x9   : > { %s4708_s18 = smov (%p27_p4, %s4706_s18), 0  ;;  %155 = sbr.rel (%p152_p3) target bundleno = 396 (0x18c), region = 32 }
   0xe   : > { %v2814_v0 = vld [vmem:[%s4652_s1 + $0x4] sm:$0xf]  ;;  %vm472_vm0 = vcmask 1043456   ;;  %p180_p5 = scmp.lt.s32.totalorder %s3440_s13, 1  ;;  %v217_v2 = vld [vmem:[%s4652_s1] sm:$0xf] }
   0xf   : > { %3340 = vmatprep.subr.msk.bf16.mxu1 %vm472_vm0, %v2814_v0  ;;  %3339 = vmatprep.subr.msk.bf16.mxu0 %vm472_vm0, %v2814_v0  ;;  %v474_v1 = vsel %vm472_vm0, %v2814_v0, 0  ;;  %v2855_v3 = vld [vmem:[%s4652_s1 + $0x8] sm:$0xf]  ;;  %s3093_s25 = smul.u32 96, %s3436_s12  ;;  %vm226_vm1 = vsmask.f32 3328 }
  0x10   : > { %3338 = vmatpush3.bf16.msra.mxu1 %v474_v1  ;;  %3176 = vmatpush3.bf16.msra.mxu0 %v474_v1  ;;  %s4710_s13 = smov (!%p180_p5, %s3440_s13), 1  ;;  %vm227_vm2 = vsmask.f32 7440  ;;  %vm447_vm3 = vcmask 64512   ;;  %v3553_v15 = vsel %vm472_vm0, %v217_v2, 0  ;;  %v3573_v34 = vsel %vm472_vm0, %v2855_v3, 0 }
  0x11   : > { %3341 = vmatprep.subr.msk.bf16.mxu1 %vm472_vm0, %v217_v2  ;;  %3342 = vmatprep.subr.msk.bf16.mxu0 %vm472_vm0, %v2855_v3  ;;  %s3349_s26 = smul.u32 216, %s4710_s13  ;;  %vm3568_vm4 = vmor %vm226_vm1, %vm227_vm2  ;;  %vm761_vm5 = vcmask 1042432   ;;  %vm762_vm6 = vcmask 1046532   ;;  %s2807_s23 = sshll.u32 %s3436_s12, 3 }
  0x12   : > { %vm3704_vm7 = vmor %vm761_vm5, %vm762_vm6  ;;  %p188_p6 = scmp.lt.s32.totalorder %s2807_s23, 15  ;;  %s2809_s24 = sshll.u32 %s4710_s13, 5 }
  0x13   : > { %s184_s29 = scalar_lea.vmem %s4651_s0, %s3349_s26 }
  0x14   : > { %s3527_s30 = scalar_lea.vmem %s184_s29, %s3093_s25  ;;  %s4712_s23 = smov (!%p188_p6, %s2807_s23), 15 }
  0x15   : > { %v3530_v4 = vld [vmem:[%s3527_s30] sm:$0xf]  ;;  %v3533_v5 = vld [vmem:[%s3527_s30 + $0x4] sm:$0xf]  ;;  %v3536_v6 = vld [vmem:[%s3527_s30 + $0x8] sm:$0x1] }
  0x16   : > { %v230_v7 = vshrl.u32 %v3530_v4, 16  ;;  %v233_v8 = vshll.u32 %v3530_v4, 16  ;;  %v239_v9 = vshll.u32 %v3533_v5, 16  ;;  %v243_v10 = vshrl.u32 %v3533_v5, 16  ;;  %v3543_v11 = vld [vmem:[%s3527_s30 + $0x30] sm:$0xf] }
  0x17   : > { %v249_v12 = vshll.u32 %v3536_v6, 16  ;;  %v3547_v13 = vld [vmem:[%s3527_s30 + $0x34] sm:$0xf]  ;;  %v3550_v14 = vld [vmem:[%s3527_s30 + $0x38] sm:$0x1]  ;;  %v326_v21 = vshrl.u32 %v3543_v11, 16 }
  0x18   : > { %v232_v16 = vrot.slane %v230_v7, 4  ;;  %v235_v17 = vrot.slane %v233_v8, 5  ;;  %v241_v18 = vrot.slane %v239_v9, 5  ;;  %v245_v19 = vrot.slane %v243_v10, 4  ;;  %v3561_v28 = vld [vmem:[%s3527_s30 + $0xc] sm:$0xf] }
  0x19   : > { %v251_v20 = vrot.slane %v249_v12, 5  ;;  %v329_v22 = vshll.u32 %v3543_v11, 16  ;;  %v335_v23 = vshll.u32 %v3547_v13, 16  ;;  %v339_v26 = vshrl.u32 %v3547_v13, 16  ;;  %v3564_v29 = vld [vmem:[%s3527_s30 + $0x10] sm:$0xf] }
  0x1a   : > { %v236_v24 = vor.u32 %v235_v17, %v232_v16  ;;  %v246_v25 = vor.u32 %v245_v19, %v241_v18  ;;  %v345_v27 = vshll.u32 %v3550_v14, 16  ;;  %v328_v31 = vrot.slane %v326_v21, 4  ;;  %v3576_v40 = vld [vmem:[%s3527_s30 + $0x14] sm:$0x1]  ;;  %v3587_v52 = vld [vmem:[%s3527_s30 + $0x3c] sm:$0xf] }
  0x1b   : > { %v331_v32 = vrot.slane %v329_v22, 5  ;;  %v337_v33 = vrot.slane %v335_v23, 5  ;;  %v341_v37 = vrot.slane %v339_v26, 4  ;;  %v254_v41 = vshrl.u32 %v3561_v28, 16  ;;  %v3591_v57 = vld [vmem:[%s3527_s30 + $0x40] sm:$0xf] }
  0x1c   : > { %v237_v35 = vrot.slane %v236_v24, 4  ;;  %v247_v36 = vrot.slane %v246_v25, 4  ;;  %v347_v38 = vrot.slane %v345_v27, 5  ;;  %v257_v42 = vshll.u32 %v3561_v28, 16  ;;  %v3599_v62 = vld [vmem:[%s3527_s30 + $0x44] sm:$0x1] }
  0x1d   : > { %v332_v39 = vor.u32 %v331_v32, %v328_v31  ;;  %v263_v43 = vshll.u32 %v3564_v29, 16  ;;  %v342_v46 = vor.u32 %v341_v37, %v337_v33  ;;  %v267_v47 = vshrl.u32 %v3564_v29, 16  ;;  %v3605_v3 = vld [vmem:[%s3527_s30 + $0x18] sm:$0xf]  ;;  %v3612_v19 = vld [vmem:[%s3527_s30 + $0x1c] sm:$0xf] }
  0x1e   : > { %v242_v44 = vsel %vm3568_vm4, %v237_v35, %v241_v18  ;;  %v252_v45 = vsel %vm3568_vm4, %v247_v36, %v251_v20  ;;  %v256_v50 = vrot.slane %v254_v41, 4  ;;  %v259_v51 = vrot.slane %v257_v42, 5  ;;  %v3618_v23 = vld [vmem:[%s3527_s30 + $0x20] sm:$0x1]  ;;  %v3625_v32 = vld [vmem:[%s3527_s30 + $0x48] sm:$0xf] }
  0x1f   : > { %v2815_v48 = vcombine.low %v242_v44, %v252_v45  ;;  %v333_v49 = vrot.slane %v332_v39, 4  ;;  %v343_v53 = vrot.slane %v342_v46, 4  ;;  %v265_v54 = vrot.slane %v263_v43, 5  ;;  %v3636_v44 = vld [vmem:[%s3527_s30 + $0x4c] sm:$0xf]  ;;  %s2808_s12 = sshll.u32 %s4712_s23, 1 }
  0x20   : > { %v269_v55 = vrot.slane %v267_v47, 4  ;;  %v273_v56 = vshll.u32 %v3576_v40, 16  ;;  %v769_v58 = vrot.slane %v3536_v6, 5  ;;  %v260_v60 = vor.u32 %v259_v51, %v256_v50  ;;  %s192_s25 = sadd.s32 %s2809_s24, %s2808_s12 }
  0x21   : > { %3177 = vmatprep.mubr.msk.bf16.mxu0 %vm447_vm3, %v2815_v48  ;;  %v338_v59 = vsel %vm3568_vm4, %v333_v49, %v337_v33  ;;  %v773_v61 = vrot.slane %v3564_v29, 5  ;;  %v348_v63 = vsel %vm3568_vm4, %v343_v53, %v347_v38  ;;  %v350_v2 = vshrl.u32 %v3587_v52, 16  ;;  %v3631_v38 = vld [vmem:[%s4652_s1 + $0x10] sm:$0xf]  ;;  %s2810_s13 = sshll.u32 %s192_s25, 3 }
  0x22   : > { %v270_v0 = vor.u32 %v269_v55, %v265_v54  ;;  %v275_v1 = vrot.slane %v273_v56, 5  ;;  %v2819_v7 = vcombine.low %v338_v59, %v348_v63  ;;  %v261_v8 = vrot.slane %v260_v60, 4  ;;  %v3649_v63 = vld [vmem:[%s3527_s30 + $0x24] sm:$0xf] }
  0x23   : > { %v353_v9 = vshll.u32 %v3587_v52, 16  ;;  %v359_v10 = vshll.u32 %v3591_v57, 16  ;;  %v352_v16 = vrot.slane %v350_v2, 4  ;;  %v363_v17 = vshrl.u32 %v3591_v57, 16 }
  0x24   : > { %v271_v12 = vrot.slane %v270_v0, 4  ;;  %v369_v18 = vshll.u32 %v3599_v62, 16  ;;  %3185 = vmatprep.mubr.msk.bf16.mxu1 %vm447_vm3, %v2819_v7  ;;  %v266_v20 = vsel %vm3568_vm4, %v261_v8, %v265_v54  ;;  %v278_v24 = vshrl.u32 %v3605_v3, 16  ;;  %v3643_v54 = vld [vmem:[%s3527_s30 + $0x50] sm:$0x1] }
  0x25   : > { %v355_v21 = vrot.slane %v353_v9, 5  ;;  %v361_v22 = vrot.slane %v359_v10, 5  ;;  %v365_v26 = vrot.slane %v363_v17, 4  ;;  %v281_v31 = vshll.u32 %v3605_v3, 16  ;;  %v3657_v7 = vld [vmem:[%s3527_s30 + $0x28] sm:$0xf] }
  0x26   : > { %v276_v25 = vsel %vm3568_vm4, %v271_v12, %v275_v1  ;;  %v371_v27 = vrot.slane %v369_v18, 5  ;;  %v280_v36 = vrot.slane %v278_v24, 4  ;;  %v287_v37 = vshll.u32 %v3612_v19, 16  ;;  %v3662_v8 = vld [vmem:[%s4652_s1 + $0xc] sm:$0xf] }
  0x27   : > { %v2816_v33 = vcombine.low %v266_v20, %v276_v25  ;;  %v356_v35 = vor.u32 %v355_v21, %v352_v16  ;;  %v366_v39 = vor.u32 %v365_v26, %v361_v22  ;;  %v283_v41 = vrot.slane %v281_v31, 5  ;;  %v3666_v17 = vld [vmem:[%s3527_s30 + $0x2c] sm:$0x1]  ;;  %v3672_v24 = vld [vmem:[%s3527_s30 + $0x54] sm:$0xf] }
  0x28   : > { %v291_v42 = vshrl.u32 %v3612_v19, 16  ;;  %v297_v43 = vshll.u32 %v3618_v23, 16  ;;  %v289_v46 = vrot.slane %v287_v37, 5  ;;  %v374_v47 = vshrl.u32 %v3625_v32, 16 }
  0x29   : > { %3178 = vmatmul.mubr.msk.bf16.vlgmr.msra.gmra.mxu0 %vm447_vm3, %v2816_v33  ;;  %v357_v45 = vrot.slane %v356_v35, 4  ;;  %v377_v48 = vshll.u32 %v3625_v32, 16  ;;  %v367_v49 = vrot.slane %v366_v39, 4  ;;  %v284_v50 = vor.u32 %v283_v41, %v280_v36  ;;  %v3678_v33 = vld [vmem:[%s3527_s30 + $0x58] sm:$0xf] }
  0x2a   : > { %3212 = vmatpush3.bf16.msra.mxu0 %v3573_v34  ;;  %v293_v51 = vrot.slane %v291_v42, 4  ;;  %v299_v53 = vrot.slane %v297_v43, 5  ;;  %v376_v56 = vrot.slane %v374_v47, 4  ;;  %v383_v60 = vshll.u32 %v3636_v44, 16 }
  0x2b   : > { %v362_v55 = vsel %vm3568_vm4, %v357_v45, %v361_v22  ;;  %v379_v59 = vrot.slane %v377_v48, 5  ;;  %3344 = vmatprep.subr.msk.bf16.mxu0 %vm472_vm0, %v3631_v38  ;;  %v372_v34 = vsel %vm3568_vm4, %v367_v49, %v371_v27  ;;  %v285_v0 = vrot.slane %v284_v50, 4  ;;  %v737_v50 = vld [vmem:[%s3527_s30] sm:$0xe] }
  0x2c   : > { %v294_v1 = vor.u32 %v293_v51, %v289_v46  ;;  %v387_v2 = vshrl.u32 %v3636_v44, 16  ;;  %v2820_v9 = vcombine.low %v362_v55, %v372_v34  ;;  %v385_v12 = vrot.slane %v383_v60, 5 }
  0x2d   : > { %v380_v10 = vor.u32 %v379_v59, %v376_v56  ;;  %v393_v16 = vshll.u32 %v3643_v54, 16  ;;  %v290_v18 = vsel %vm3568_vm4, %v285_v0, %v289_v46  ;;  %v302_v22 = vshrl.u32 %v3649_v63, 16  ;;  %v3687_v46 = vld [vmem:[%s3527_s30 + $0x5c] sm:$0x1] }
  0x2e   : > { %v295_v20 = vrot.slane %v294_v1, 4  ;;  %v389_v21 = vrot.slane %v387_v2, 4  ;;  %3186 = vmatmul.mubr.msk.bf16.vlgmr.msra.gmra.mxu1 %vm447_vm3, %v2820_v9  ;;  %v305_v27 = vshll.u32 %v3649_v63, 16  ;;  %v311_v31 = vshll.u32 %v3657_v7, 16 }
  0x2f   : > { %v381_v25 = vrot.slane %v380_v10, 4  ;;  %v395_v26 = vrot.slane %v393_v16, 5  ;;  %3194 = vmatpush3.bf16.msra.mxu1 %v3553_v15  ;;  %v304_v37 = vrot.slane %v302_v22, 4  ;;  %v315_v39 = vshrl.u32 %v3657_v7, 16 }
  0x30   : > { %v300_v35 = vsel %vm3568_vm4, %v295_v20, %v299_v53  ;;  %v390_v36 = vor.u32 %v389_v21, %v385_v12  ;;  %v307_v43 = vrot.slane %v305_v27, 5  ;;  %v313_v45 = vrot.slane %v311_v31, 5  ;;  %3343 = vmatprep.subr.msk.bf16.mxu1 %vm472_vm0, %v3662_v8 }
  0x31   : > { %v2817_v41 = vcombine.low %v290_v18, %v300_v35  ;;  %v386_v42 = vsel %vm3568_vm4, %v381_v25, %v385_v12  ;;  %v317_v15 = vrot.slane %v315_v39, 4  ;;  %v321_v48 = vshll.u32 %v3666_v17, 16  ;;  %v738_v12 = vld [vmem:[%s3527_s30 + $0xc] sm:$0xe] }
  0x32   : > { %v391_v47 = vrot.slane %v390_v36, 4  ;;  %v398_v49 = vshrl.u32 %v3672_v24, 16  ;;  %v308_v51 = vor.u32 %v307_v43, %v304_v37  ;;  %v401_v53 = vshll.u32 %v3672_v24, 16 }
  0x33   : > { %3181 = vmatprep.mubr.msk.bf16.mxu0 %vm447_vm3, %v2817_v41  ;;  %v407_v55 = vshll.u32 %v3678_v33, 16  ;;  %v411_v56 = vshrl.u32 %v3678_v33, 16  ;;  %v318_v60 = vor.u32 %v317_v15, %v313_v45  ;;  %v323_v34 = vrot.slane %v321_v48, 5  ;;  %v739_v41 = vld [vmem:[%s3527_s30 + $0x18] sm:$0xe] }
  0x34   : > { %v396_v59 = vsel %vm3568_vm4, %v391_v47, %v395_v26  ;;  %v400_v0 = vrot.slane %v398_v49, 4  ;;  %v309_v2 = vrot.slane %v308_v51, 4  ;;  %v403_v9 = vrot.slane %v401_v53, 5 }
  0x35   : > { %v2821_v1 = vcombine.low %v386_v42, %v396_v59  ;;  %v409_v10 = vrot.slane %v407_v55, 5  ;;  %v319_v16 = vrot.slane %v318_v60, 4  ;;  %v413_v18 = vrot.slane %v411_v56, 4  ;;  %v741_v55 = vld [vmem:[%s3527_s30 + $0x30] sm:$0xe] }
  0x36   : > { %v417_v20 = vshll.u32 %v3687_v46, 16  ;;  %v2847_v22 = vrot.slane %v737_v50, 9  ;;  %v776_v25 = vrot.slane %v3576_v40, 5  ;;  %v314_v26 = vsel %vm3568_vm4, %v309_v2, %v313_v45 }
  0x37   : > { %3189 = vmatprep.mubr.msk.bf16.mxu1 %vm447_vm3, %v2821_v1  ;;  %v404_v27 = vor.u32 %v403_v9, %v400_v0  ;;  %v766_v31 = vrot.slane %v3533_v5, 5  ;;  %v324_v35 = vsel %vm3568_vm4, %v319_v16, %v323_v34  ;;  %v414_v36 = vor.u32 %v413_v18, %v409_v10  ;;  %v2999_v1 = vld [vmem:[%s4652_s1 + $0x18] sm:$0xf] }
  0x38   : > { %v419_v37 = vrot.slane %v417_v20, 5  ;;  %v2848_v39 = vrot.slane %v738_v12, 9  ;;  %v2818_v42 = vcombine.low %v314_v26, %v324_v35  ;;  %v2831_v45 = vcombine.low %v3530_v4, %v3533_v5  ;;  %v740_v5 = vld [vmem:[%s3527_s30 + $0x24] sm:$0xe]  ;;  %v742_v12 = vld [vmem:[%s3527_s30 + $0x3c] sm:$0xe] }
  0x39   : > { %v405_v43 = vrot.slane %v404_v27, 4  ;;  %v767_v40 = vsel %vm3704_vm7, %v2847_v22, %v766_v31  ;;  %v768_v47 = vrot.slane %v766_v31, 4  ;;  %v415_v15 = vrot.slane %v414_v36, 4 }
  0x3a   : > { %v774_v48 = vsel %vm3704_vm7, %v2848_v39, %v773_v61  ;;  %v775_v49 = vrot.slane %v773_v61, 4  ;;  %3182 = vmatmul.mubr.msk.bf16.gmra.mxu0 %vm447_vm3, %v2818_v42  ;;  %v2849_v53 = vrot.slane %v739_v41, 9  ;;  %v780_v4 = vrot.slane %v3612_v19, 5  ;;  %v743_v41 = vld [vmem:[%s3527_s30 + $0x48] sm:$0xe] }
  0x3b   : > { %v410_v50 = vsel %vm3568_vm4, %v405_v43, %v409_v10  ;;  %v770_v51 = vsel %vm3704_vm7, %v768_v47, %v769_v58  ;;  %v420_v56 = vsel %vm3568_vm4, %v415_v15, %v419_v37  ;;  %v783_v60 = vrot.slane %v3618_v23, 5  ;;  %v3782_v42 = vld [vmem:[%s3527_s30 + $0x54] sm:$0xe]  ;;  %v2907_v43 = vld [vmem:[%s3527_s30 + $0xc] sm:$0xf] }
  0x3c   : > { %v2856_v61 = vcombine.low %v767_v40, %v770_v51  ;;  %v777_v59 = vsel %vm3704_vm7, %v775_v49, %v776_v25  ;;  %v2822_v34 = vcombine.low %v410_v50, %v420_v56  ;;  %v1073_v6 = vsel %vm472_vm0, %v3662_v8, 0  ;;  %v3802_v49 = vld [vmem:[%s4652_s1 + $0x14] sm:$0xf] }
  0x3d   : > { %v781_v58 = vsel %vm3704_vm7, %v2849_v53, %v780_v4  ;;  %v782_v0 = vrot.slane %v780_v4, 4  ;;  %v797_v2 = vrot.slane %v3550_v14, 5  ;;  %v2850_v9 = vrot.slane %v740_v5, 9  ;;  %v2910_v5 = vld [vmem:[%s3527_s30 + $0x18] sm:$0xf] }
  0x3e   : > { %3213 = vmatprep.mubr.msk.bf16.mxu0 %vm447_vm3, %v2856_v61  ;;  %v787_v10 = vrot.slane %v3657_v7, 5  ;;  %v790_v23 = vrot.slane %v3666_v17, 5  ;;  %3190 = vmatmul.mubr.msk.bf16.gmra.mxu1 %vm447_vm3, %v2822_v34  ;;  %v2857_v8 = vcombine.low %v774_v48, %v777_v59  ;;  %v2851_v18 = vrot.slane %v741_v55, 9  ;;  %v3797_v48 = vld [vmem:[%s3527_s30 + $0x14] sm:$0x1] }
  0x3f   : > { %v784_v16 = vsel %vm3704_vm7, %v782_v0, %v783_v60  ;;  %v794_v20 = vrot.slane %v3547_v13, 5  ;;  %3195 = vmatprep.mubr.msk.bf16.mxu1 %vm447_vm3, %v2831_v45  ;;  %v1455_v14 = vsel %vm472_vm0, %v3631_v38, 0  ;;  %v3761_v17 = vsel %vm472_vm0, %v2999_v1, 0  ;;  %v3813_v60 = vld [vmem:[%s3527_s30 + $0x1c] sm:$0xf] }
  0x40   : > { %v2858_v22 = vcombine.low %v781_v58, %v784_v16  ;;  %v789_v25 = vrot.slane %v787_v10, 4  ;;  %v2832_v26 = vcombine.low %v3561_v28, %v3564_v29  ;;  %v2852_v31 = vrot.slane %v742_v12, 9 }
  0x41   : > { %v796_v27 = vrot.slane %v794_v20, 4  ;;  %v801_v35 = vrot.slane %v3591_v57, 5  ;;  %v2833_v36 = vcombine.low %v3605_v3, %v3612_v19  ;;  %v788_v38 = vsel %vm3704_vm7, %v2850_v9, %v787_v10 }
  0x42   : > { %v791_v37 = vsel %vm3704_vm7, %v789_v25, %v790_v23  ;;  %v795_v39 = vsel %vm3704_vm7, %v2851_v18, %v794_v20  ;;  %3214 = vmatmul.mubr.msk.bf16.vlgmr.msra.gmra.mxu0 %vm447_vm3, %v2857_v8  ;;  %v2834_v28 = vcombine.low %v3649_v63, %v3657_v7  ;;  %v804_v19 = vrot.slane %v3599_v62, 5  ;;  %v3794_v62 = vld [vmem:[%s3527_s30 + $0x10] sm:$0xf] }
  0x43   : > { %v798_v29 = vsel %vm3704_vm7, %v796_v27, %v797_v2  ;;  %v803_v3 = vrot.slane %v801_v35, 4  ;;  %3248 = vmatpush3.bf16.msra.mxu0 %v1455_v14  ;;  %3217 = vmatprep.mubr.msk.bf16.mxu0 %vm447_vm3, %v2858_v22  ;;  %v2835_v40 = vcombine.low %v3543_v11, %v3547_v13  ;;  %v2836_v47 = vcombine.low %v3587_v52, %v3591_v57  ;;  %v2913_v2 = vld [vmem:[%s3527_s30 + $0x24] sm:$0xf]  ;;  %v3836_v22 = vld [vmem:[%s3527_s30 + $0x20] sm:$0x1] }
  0x44   : > { %v2837_v15 = vcombine.low %v3625_v32, %v3636_v44  ;;  %v808_v45 = vrot.slane %v3636_v44, 5  ;;  %v2859_v50 = vcombine.low %v788_v38, %v791_v37  ;;  %v2860_v51 = vcombine.low %v795_v39, %v798_v29  ;;  %3346 = vmatprep.subr.msk.bf16.mxu0 %vm472_vm0, %v2999_v1  ;;  %v2919_v13 = vld [vmem:[%s3527_s30 + $0x3c] sm:$0xf]  ;;  %v3909_v57 = vld [vmem:[%s3527_s30 + $0x4c] sm:$0xf] }
  0x45   : > { %v3806_v53 = vsel %vm3704_vm7, %v2852_v31, %v801_v35  ;;  %v2853_v4 = vrot.slane %v743_v41, 9  ;;  %v811_v56 = vrot.slane %v3643_v54, 5  ;;  %v815_v61 = vrot.slane %v3678_v33, 5  ;;  %v3842_v35 = vld [vmem:[%s3527_s30 + $0x28] sm:$0xf] }
  0x46   : > { %v810_v55 = vrot.slane %v808_v45, 4  ;;  %v1213_v59 = vshrl.u32 %v2907_v43, 16  ;;  %3196 = vmatmul.mubr.msk.bf16.vlgmr.msra.gmra.mxu1 %vm447_vm3, %v2832_v26  ;;  %v3818_v34 = vsel %vm3704_vm7, %v803_v3, %v804_v19  ;;  %v2838_v58 = vcombine.low %v3672_v24, %v3678_v33 }
  0x47   : > { %v1216_v0 = vshll.u32 %v2907_v43, 16  ;;  %v1222_v1 = vshll.u32 %v3794_v62, 16  ;;  %3230 = vmatpush3.bf16.msra.mxu1 %v1073_v6  ;;  %3199 = vmatprep.mubr.msk.bf16.mxu1 %vm447_vm3, %v2833_v36  ;;  %v2854_v54 = vrot.slane %v3782_v42, 9  ;;  %v1226_v10 = vshrl.u32 %v3794_v62, 16  ;;  %v3848_v42 = vld [vmem:[%s3527_s30 + $0x2c] sm:$0x1] }
  0x48   : > { %v1215_v9 = vrot.slane %v1213_v59, 4  ;;  %v1232_v23 = vshll.u32 %v3797_v48, 16  ;;  %v809_v12 = vsel %vm3704_vm7, %v2853_v4, %v808_v45  ;;  %v818_v8 = vrot.slane %v3687_v46, 5  ;;  %3345 = vmatprep.subr.msk.bf16.mxu1 %vm472_vm0, %v3802_v49 }
  0x49   : > { %v1218_v16 = vrot.slane %v1216_v0, 5  ;;  %v1224_v18 = vrot.slane %v1222_v1, 5  ;;  %v812_v6 = vsel %vm3704_vm7, %v810_v55, %v811_v56  ;;  %v817_v20 = vrot.slane %v815_v61, 4 }
  0x4a   : > { %v1228_v14 = vrot.slane %v1226_v10, 4  ;;  %v1237_v25 = vshrl.u32 %v2910_v5, 16  ;;  %3218 = vmatmul.mubr.msk.bf16.gmra.mxu0 %vm447_vm3, %v2859_v50  ;;  %v1240_v27 = vshll.u32 %v2910_v5, 16  ;;  %v1246_v46 = vshll.u32 %v3813_v60, 16  ;;  %v2916_v5 = vld [vmem:[%s3527_s30 + $0x30] sm:$0xf] }
  0x4b   : > { %v1219_v26 = vor.u32 %v1218_v16, %v1215_v9  ;;  %v1250_v31 = vshrl.u32 %v3813_v60, 16  ;;  %3221 = vmatprep.mubr.msk.bf16.mxu0 %vm447_vm3, %v2860_v51  ;;  %v1234_v38 = vrot.slane %v1232_v23, 5  ;;  %v1261_v39 = vshrl.u32 %v2913_v2, 16  ;;  %v3881_v9 = vld [vmem:[%s3527_s30 + $0x38] sm:$0x1] }
  0x4c   : > { %v1229_v36 = vor.u32 %v1228_v14, %v1224_v18  ;;  %v1239_v37 = vrot.slane %v1237_v25, 4  ;;  %v1242_v29 = vrot.slane %v1240_v27, 5  ;;  %v3845_v3 = vrot.slane %v1246_v46, 5  ;;  %v3888_v25 = vld [vmem:[%s3527_s30 + $0x40] sm:$0xf] }
  0x4d   : > { %v1220_v41 = vrot.slane %v1219_v26, 4  ;;  %v1252_v19 = vrot.slane %v1250_v31, 4  ;;  %v2861_v43 = vcombine.low %v3806_v53, %v3818_v34  ;;  %v1263_v50 = vrot.slane %v1261_v39, 4  ;;  %v3869_v34 = vld [vmem:[%s3527_s30 + $0x34] sm:$0xf] }
  0x4e   : > { %v1230_v45 = vrot.slane %v1229_v36, 4  ;;  %v1264_v4 = vshll.u32 %v2913_v2, 16  ;;  %3200 = vmatmul.mubr.msk.bf16.gmra.mxu1 %vm447_vm3, %v2834_v28  ;;  %v2862_v51 = vcombine.low %v809_v12, %v812_v6  ;;  %v816_v55 = vsel %vm3704_vm7, %v2854_v54, %v815_v61  ;;  %v3894_v36 = vld [vmem:[%s3527_s30 + $0x44] sm:$0x1] }
  0x4f   : > { %v1256_v56 = vshll.u32 %v3836_v22, 16  ;;  %v1270_v59 = vshll.u32 %v3842_v35, 16  ;;  %3203 = vmatprep.mubr.msk.bf16.mxu1 %vm447_vm3, %v2835_v40  ;;  %v819_v63 = vsel %vm3704_vm7, %v817_v20, %v818_v8  ;;  %v1243_v7 = vor.u32 %v1242_v29, %v1239_v37 }
  0x50   : > { %v1266_v53 = vrot.slane %v1264_v4, 5  ;;  %v1274_v28 = vshrl.u32 %v3842_v35, 16  ;;  %v1225_v61 = vsel %vm3568_vm4, %v1220_v41, %v1224_v18  ;;  %v1235_v0 = vsel %vm3568_vm4, %v1230_v45, %v1234_v38 }
  0x51   : > { %v1253_v1 = vor.u32 %v1252_v19, %v3845_v3  ;;  %v3876_v11 = vrot.slane %v1270_v59, 5  ;;  %v1280_v54 = vshll.u32 %v3848_v42, 16  ;;  %v1285_v10 = vshrl.u32 %v2916_v5, 16 }
  0x52   : > { %v1267_v40 = vor.u32 %v1266_v53, %v1263_v50  ;;  %v1276_v2 = vrot.slane %v1274_v28, 4  ;;  %3222 = vmatmul.mubr.msk.bf16.gmra.mxu0 %vm447_vm3, %v2861_v43  ;;  %v2863_v23 = vcombine.low %v816_v55, %v819_v63  ;;  %v1258_v12 = vrot.slane %v1256_v56, 5  ;;  %v2922_v50 = vld [vmem:[%s3527_s30 + $0x48] sm:$0xf] }
  0x53   : > { %v1288_v8 = vshll.u32 %v2916_v5, 16  ;;  %v1294_v16 = vshll.u32 %v3869_v34, 16  ;;  %3225 = vmatprep.mubr.msk.bf16.mxu0 %vm447_vm3, %v2862_v51  ;;  %v2932_v18 = vcombine.low %v1225_v61, %v1235_v0  ;;  %v1244_v6 = vrot.slane %v1243_v7, 4  ;;  %v3398_v61 = vld [vmem:[%s3527_s30 + $0xc] sm:$0xff]  }
  0x54   : > { %v1277_v20 = vor.u32 %v1276_v2, %v3876_v11  ;;  %v1287_v14 = vrot.slane %v1285_v10, 4  ;;  %v1254_v26 = vrot.slane %v1253_v1, 4  ;;  %v1298_v31 = vshrl.u32 %v3869_v34, 16  ;;  %v2925_v2 = vld [vmem:[%s3527_s30 + $0x54] sm:$0xf] }
  0x55   : > { %v1290_v27 = vrot.slane %v1288_v8, 5  ;;  %v3890_v46 = vrot.slane %v1294_v16, 5  ;;  %v1268_v38 = vrot.slane %v1267_v40, 4  ;;  %v1282_v37 = vrot.slane %v1280_v54, 5 }
  0x56   : > { %v1309_v39 = vshrl.u32 %v2919_v13, 16  ;;  %v1312_v41 = vshll.u32 %v2919_v13, 16  ;;  %3204 = vmatmul.mubr.msk.bf16.gmra.mxu1 %vm447_vm3, %v2836_v47  ;;  %v1278_v29 = vrot.slane %v1277_v20, 4  ;;  %v1300_v19 = vrot.slane %v1298_v31, 4 }
  0x57   : > { %v1304_v43 = vshll.u32 %v3881_v9, 16  ;;  %v1318_v45 = vshll.u32 %v3888_v25, 16  ;;  %3207 = vmatprep.mubr.msk.bf16.mxu1 %vm447_vm3, %v2837_v15  ;;  %v1291_v4 = vor.u32 %v1290_v27, %v1287_v14  ;;  %v1322_v52 = vshrl.u32 %v3888_v25, 16 }
  0x58   : > { %v1311_v5 = vrot.slane %v1309_v39, 4  ;;  %v1314_v51 = vrot.slane %v1312_v41, 5  ;;  %v1249_v47 = vsel %vm3568_vm4, %v1244_v6, %v3845_v3  ;;  %v1259_v55 = vsel %vm3568_vm4, %v1254_v26, %v1258_v12  ;;  %v3933_v12 = vld [vmem:[%s3527_s30 + $0x58] sm:$0xf]  ;;  %v3951_v39 = vld [vmem:[%s3527_s30 + $0x5c] sm:$0x1] }
  0x59   : > { %v1301_v56 = vor.u32 %v1300_v19, %v3890_v46  ;;  %v3917_v32 = vrot.slane %v1318_v45, 5  ;;  %v1324_v15 = vrot.slane %v1322_v52, 4  ;;  %v1328_v59 = vshll.u32 %v3894_v36, 16  ;;  %v3399_v52 = vld [vmem:[%s3527_s30 + $0x18] sm:$0xff]  }
  0x5a   : > { %v1315_v44 = vor.u32 %v1314_v51, %v1311_v5  ;;  %v1333_v63 = vshrl.u32 %v2922_v50, 16  ;;  %3226 = vmatmul.mubr.msk.bf16.gmra.mxu0 %vm447_vm3, %v2863_v23  ;;  %v1273_v3 = vsel %vm3568_vm4, %v1268_v38, %v3876_v11  ;;  %v1283_v7 = vsel %vm3568_vm4, %v1278_v29, %v1282_v37  ;;  %v3968_v51 = vld [vmem:[%s4652_s1 + $0x20] sm:$0xf] }
  0x5b   : > { %v1336_v53 = vshll.u32 %v2922_v50, 16  ;;  %v1342_v28 = vshll.u32 %v3909_v57, 16  ;;  %3249 = vmatprep.mubr.msk.bf16.mxu0 %vm447_vm3, %v2932_v18  ;;  %v1292_v0 = vrot.slane %v1291_v4, 4  ;;  %v1302_v1 = vrot.slane %v1301_v56, 4  ;;  %v3936_v18 = vld [vmem:[%s3527_s30 + $0x50] sm:$0x1] }
  0x5c   : > { %v1306_v13 = vrot.slane %v1304_v43, 5  ;;  %v1325_v40 = vor.u32 %v1324_v15, %v3917_v32  ;;  %v1316_v54 = vrot.slane %v1315_v44, 4  ;;  %v1335_v10 = vrot.slane %v1333_v63, 4  ;;  %v3961_v43 = vld [vmem:[%s3527_s30 + $0x64] sm:$0xf] }
  0x5d   : > { %v1338_v23 = vrot.slane %v1336_v53, 5  ;;  %v1346_v11 = vshrl.u32 %v3909_v57, 16  ;;  %v2933_v8 = vcombine.low %v1249_v47, %v1259_v55  ;;  %v2934_v16 = vcombine.low %v1273_v3, %v1283_v7  ;;  %v3400_v44 = vld [vmem:[%s3527_s30 + $0x24] sm:$0xff]  }
  0x5e   : > { %v1326_v6 = vrot.slane %v1325_v40, 4  ;;  %v1330_v20 = vrot.slane %v1328_v59, 5  ;;  %3208 = vmatmul.mubr.msk.bf16.gmra.mxu1 %vm447_vm3, %v2838_v58  ;;  %v3942_v14 = vrot.slane %v1342_v28, 5  ;;  %v1357_v27 = vshrl.u32 %v2925_v2, 16  ;;  %v2928_v58 = vld [vmem:[%s3527_s30 + $0x60] sm:$0xf] }
  0x5f   : > { %v1348_v26 = vrot.slane %v1346_v11, 4  ;;  %v1360_v31 = vshll.u32 %v2925_v2, 16  ;;  %3231 = vmatprep.mubr.msk.bf16.mxu1 %vm447_vm3, %v3398_v61  ;;  %v1297_v38 = vsel %vm3568_vm4, %v1292_v0, %v3890_v46  ;;  %v1307_v37 = vsel %vm3568_vm4, %v1302_v1, %v1306_v13  ;;  %v3040_v0 = vld [vmem:[%s4652_s1 + $0x1c] sm:$0xf]  ;;  %v3989_v11 = vld [vmem:[%s3527_s30 + $0x68] sm:$0x1] }
  0x60   : > { %v1366_v24 = vshll.u32 %v3933_v12, 16  ;;  %v1370_v33 = vshrl.u32 %v3933_v12, 16  ;;  %v1321_v41 = vsel %vm3568_vm4, %v1316_v54, %v3917_v32  ;;  %v1339_v29 = vor.u32 %v1338_v23, %v1335_v10 }
  0x61   : > { %v1352_v19 = vshll.u32 %v3936_v18, 16  ;;  %v1359_v46 = vrot.slane %v1357_v27, 4  ;;  %v1331_v45 = vsel %vm3568_vm4, %v1326_v6, %v1330_v20  ;;  %v1362_v50 = vrot.slane %v1360_v31, 5 }
  0x62   : > { %v1368_v4 = vrot.slane %v1366_v24, 5  ;;  %v1372_v5 = vrot.slane %v1370_v33, 4  ;;  %3250 = vmatmul.mubr.msk.bf16.vlgmr.msra.gmra.mxu0 %vm447_vm3, %v2933_v8  ;;  %v1349_v47 = vor.u32 %v1348_v26, %v3942_v14  ;;  %v1376_v55 = vshll.u32 %v3951_v39, 16  ;;  %v3401_v8 = vld [vmem:[%s3527_s30 + $0x30] sm:$0xff]   ;;  %v3402_v26 = vld [vmem:[%s3527_s30 + $0x3c] sm:$0xff]  }
  0x63   : > { %v1381_v56 = vshrl.u32 %v2928_v58, 16  ;;  %v1384_v32 = vshll.u32 %v2928_v58, 16  ;;  %3284 = vmatpush3.bf16.msra.mxu0 %v3761_v17  ;;  %3253 = vmatprep.mubr.msk.bf16.mxu0 %vm447_vm3, %v2934_v16  ;;  %v1363_v15 = vor.u32 %v1362_v50, %v1359_v46  ;;  %v1390_v63 = vshll.u32 %v3961_v43, 16  ;;  %v2948_v33 = vld [vmem:[%s3527_s30 + $0xc] sm:$0xe] }
  0x64   : > { %v1373_v59 = vor.u32 %v1372_v5, %v1368_v4  ;;  %v1709_v3 = vsel %vm472_vm0, %v3802_v49, 0  ;;  %v1394_v7 = vshrl.u32 %v3961_v43, 16  ;;  %3348 = vmatprep.subr.msk.bf16.mxu0 %vm472_vm0, %v3968_v51  ;;  %v2935_v53 = vcombine.low %v1297_v38, %v1307_v37  ;;  %v2949_v46 = vld [vmem:[%s3527_s30 + $0x18] sm:$0xe]  ;;  %v3403_v5 = vld [vmem:[%s3527_s30 + $0x48] sm:$0xff]  }
  0x65   : > { %v2936_v28 = vcombine.low %v1321_v41, %v1331_v45  ;;  %v1340_v61 = vrot.slane %v1339_v29, 4  ;;  %v1354_v17 = vrot.slane %v1352_v19, 5  ;;  %v1350_v1 = vrot.slane %v1349_v47, 4 }
  0x66   : > { %3232 = vmatmul.mubr.msk.bf16.vlgmr.msra.gmra.mxu1 %vm447_vm3, %v3399_v52  ;;  %v1378_v13 = vrot.slane %v1376_v55, 5  ;;  %v1383_v49 = vrot.slane %v1381_v56, 4  ;;  %v1386_v40 = vrot.slane %v1384_v32, 5  ;;  %v1364_v2 = vrot.slane %v1363_v15, 4  ;;  %v3404_v56 = vld [vmem:[%s3527_s30 + $0x54] sm:$0xff]  }
  0x67   : > { %3266 = vmatpush3.bf16.msra.mxu1 %v1709_v3  ;;  %3235 = vmatprep.mubr.msk.bf16.mxu1 %vm447_vm3, %v3400_v44  ;;  %v1374_v54 = vrot.slane %v1373_v59, 4  ;;  %v1392_v10 = vrot.slane %v1390_v63, 5  ;;  %v1396_v23 = vrot.slane %v1394_v7, 4  ;;  %v1345_v16 = vsel %vm3568_vm4, %v1340_v61, %v3942_v14  ;;  %v2951_v63 = vld [vmem:[%s3527_s30 + $0x30] sm:$0xe] }
  0x68   : > { %3347 = vmatprep.subr.msk.bf16.mxu1 %vm472_vm0, %v3040_v0  ;;  %v1355_v6 = vsel %vm3568_vm4, %v1350_v1, %v1354_v17  ;;  %v1387_v20 = vor.u32 %v1386_v40, %v1383_v49  ;;  %v1369_v27 = vsel %vm3568_vm4, %v1364_v2, %v1368_v4  ;;  %v1400_v37 = vshll.u32 %v3989_v11, 16  ;;  %v2950_v4 = vld [vmem:[%s3527_s30 + $0x24] sm:$0xe]  ;;  %v2952_v7 = vld [vmem:[%s3527_s30 + $0x3c] sm:$0xe] }
  0x69   : > { %v1379_v31 = vsel %vm3568_vm4, %v1374_v54, %v1378_v13  ;;  %v1397_v38 = vor.u32 %v1396_v23, %v1392_v10  ;;  %v2937_v14 = vcombine.low %v1345_v16, %v1355_v6  ;;  %v1604_v58 = vrot.slane %v3794_v62, 5  ;;  %v2953_v13 = vld [vmem:[%s3527_s30 + $0x48] sm:$0xe]  ;;  %v3016_v49 = vld [vmem:[%s3527_s30 + $0x18] sm:$0xf]  ;;  %v3405_v6 = vld [vmem:[%s3527_s30 + $0x60] sm:$0xff]  }
  0x6a   : > { %3254 = vmatmul.mubr.msk.bf16.gmra.mxu0 %vm447_vm3, %v2935_v53  ;;  %v2938_v24 = vcombine.low %v1369_v27, %v1379_v31  ;;  %v1388_v41 = vrot.slane %v1387_v20, 4  ;;  %v1402_v19 = vrot.slane %v1400_v37, 5  ;;  %v1611_v45 = vrot.slane %v3813_v60, 5 }
  0x6b   : > { %3257 = vmatprep.mubr.msk.bf16.mxu0 %vm447_vm3, %v2936_v28  ;;  %v1398_v29 = vrot.slane %v1397_v38, 4  ;;  %v1618_v50 = vrot.slane %v3842_v35, 5  ;;  %v2956_v52 = vrot.slane %v2948_v33, 9  ;;  %v1606_v47 = vrot.slane %v1604_v58, 4 }
  0x6c   : > { %v1607_v62 = vrot.slane %v3797_v48, 5  ;;  %v2957_v55 = vrot.slane %v2949_v46, 9  ;;  %v1393_v32 = vsel %vm3568_vm4, %v1388_v41, %v1392_v10  ;;  %v1613_v35 = vrot.slane %v1611_v45, 4  ;;  %v4059_v10 = vld [vmem:[%s3527_s30 + $0x1c] sm:$0xf] }
  0x6d   : > { %v1403_v60 = vsel %vm3568_vm4, %v1398_v29, %v1402_v19  ;;  %v1614_v44 = vrot.slane %v3836_v22, 5  ;;  %v2958_v15 = vrot.slane %v2950_v4, 9  ;;  %v1620_v59 = vrot.slane %v1618_v50, 4  ;;  %v3019_v29 = vld [vmem:[%s3527_s30 + $0x24] sm:$0xf]  ;;  %v3408_v4 = vld [vmem:[%s3527_s30 + $0x30] sm:$0xff]  }
  0x6e   : > { %3236 = vmatmul.mubr.msk.bf16.gmra.mxu1 %vm447_vm3, %v3401_v8  ;;  %v1621_v48 = vrot.slane %v3848_v42, 5  ;;  %v1625_v3 = vrot.slane %v3869_v34, 5  ;;  %v2939_v53 = vcombine.low %v1393_v32, %v1403_v60  ;;  %v1605_v28 = vsel %vm3704_vm7, %v2956_v52, %v1604_v58  ;;  %v3406_v42 = vld [vmem:[%s3527_s30 + $0x18] sm:$0xff]  }
  0x6f   : > { %3239 = vmatprep.mubr.msk.bf16.mxu1 %vm447_vm3, %v3402_v26  ;;  %v1608_v22 = vsel %vm3704_vm7, %v1606_v47, %v1607_v62  ;;  %v4034_v61 = vsel %vm472_vm0, %v3040_v0, 0  ;;  %v4040_v34 = vsel %vm3704_vm7, %v2957_v55, %v1611_v45  ;;  %v4044_v17 = vsel %vm3704_vm7, %v1613_v35, %v1614_v44  ;;  %v4103_v55 = vld [vmem:[%s3527_s30 + $0x28] sm:$0xf] }
  0x70   : > { %v2547_v1 = vsel %vm472_vm0, %v3968_v51, 0  ;;  %v4052_v0 = vsel %vm3704_vm7, %v2958_v15, %v1618_v50  ;;  %v4056_v40 = vsel %vm3704_vm7, %v1620_v59, %v1621_v48  ;;  %v2959_v2 = vrot.slane %v2951_v63, 9  ;;  %v3018_v15 = vld [vmem:[%s3527_s30 + $0x20] sm:$0x1] }
  0x71   : > { %v2960_v54 = vrot.slane %v2952_v7, 9  ;;  %v2965_v23 = vcombine.low %v1605_v28, %v1608_v22  ;;  %v1627_v8 = vrot.slane %v1625_v3, 4  ;;  %v1628_v16 = vrot.slane %v3881_v9, 5 }
  0x72   : > { %3258 = vmatmul.mubr.msk.bf16.gmra.mxu0 %vm447_vm3, %v2937_v14  ;;  %v1632_v51 = vrot.slane %v3888_v25, 5  ;;  %v2966_v20 = vcombine.low %v4040_v34, %v4044_v17  ;;  %v2961_v26 = vrot.slane %v2953_v13, 9  ;;  %v2051_v27 = vshrl.u32 %v3016_v49, 16  ;;  %v2954_v25 = vld [vmem:[%s3527_s30 + $0x54] sm:$0xe] }
  0x73   : > { %3261 = vmatprep.mubr.msk.bf16.mxu0 %vm447_vm3, %v2938_v24  ;;  %v2054_v31 = vshll.u32 %v3016_v49, 16  ;;  %v2967_v38 = vcombine.low %v4052_v0, %v4056_v40  ;;  %v1635_v9 = vrot.slane %v3894_v36, 5  ;;  %v2060_v37 = vshll.u32 %v4059_v10, 16  ;;  %v3407_v36 = vld [vmem:[%s3527_s30 + $0x24] sm:$0xff]  }
  0x74   : > { %v2064_v14 = vshrl.u32 %v4059_v10, 16  ;;  %v4076_v24 = vsel %vm3704_vm7, %v2959_v2, %v1625_v3  ;;  %v4080_v33 = vsel %vm3704_vm7, %v2960_v54, %v1632_v51  ;;  %v1639_v58 = vrot.slane %v3909_v57, 5  ;;  %v3058_v17 = vld [vmem:[%s3527_s30 + $0x24] sm:$0xe] }
  0x75   : > { %v1646_v41 = vrot.slane %v3933_v12, 5  ;;  %v4088_v19 = vsel %vm3704_vm7, %v1627_v8, %v1628_v16  ;;  %v1634_v46 = vrot.slane %v1632_v51, 4  ;;  %v1642_v45 = vrot.slane %v3936_v18, 5 }
  0x76   : > { %3240 = vmatmul.mubr.msk.bf16.gmra.mxu1 %vm447_vm3, %v3403_v5  ;;  %v1653_v50 = vrot.slane %v3961_v43, 5  ;;  %v4096_v57 = vsel %vm3704_vm7, %v2961_v26, %v1639_v58  ;;  %v2962_v12 = vrot.slane %v2954_v25, 9  ;;  %v2955_v5 = vld [vmem:[%s3527_s30 + $0x60] sm:$0xe]  ;;  %v2053_v52 = vrot.slane %v2051_v27, 4 }
  0x77   : > { %3243 = vmatprep.mubr.msk.bf16.mxu1 %vm447_vm3, %v3404_v56  ;;  %v2056_v47 = vrot.slane %v2054_v31, 5  ;;  %v4100_v62 = vrot.slane %v2060_v37, 5  ;;  %v2066_v18 = vrot.slane %v2064_v14, 4  ;;  %v2075_v43 = vshrl.u32 %v3019_v29, 16  ;;  %v3022_v26 = vld [vmem:[%s3527_s30 + $0x30] sm:$0xf] }
  0x78   : > { %v2078_v56 = vshll.u32 %v3019_v29, 16  ;;  %v2968_v32 = vcombine.low %v4076_v24, %v4088_v19  ;;  %v1641_v60 = vrot.slane %v1639_v58, 4  ;;  %v1648_v35 = vrot.slane %v1646_v41, 4  ;;  %v4148_v27 = vld [vmem:[%s3527_s30 + $0x34] sm:$0xf]  ;;  %v3409_v31 = vld [vmem:[%s3527_s30 + $0x3c] sm:$0xff]  }
  0x79   : > { %v1649_v44 = vrot.slane %v3951_v39, 5  ;;  %v4111_v59 = vsel %vm3704_vm7, %v1634_v46, %v1635_v9  ;;  %v2963_v48 = vrot.slane %v2955_v5, 9  ;;  %v1655_v63 = vrot.slane %v1653_v50, 4 }
  0x7a   : > { %3262 = vmatmul.mubr.msk.bf16.gmra.mxu0 %vm447_vm3, %v2939_v53  ;;  %v1656_v3 = vrot.slane %v3989_v11, 5  ;;  %v2057_v7 = vor.u32 %v2056_v47, %v2053_v52  ;;  %v3057_v53 = vld [vmem:[%s3527_s30 + $0x18] sm:$0xe]  ;;  %v2442_v28 = vrot.slane %v4059_v10, 5  ;;  %v2084_v22 = vshll.u32 %v4103_v55, 16 }
  0x7b   : > { %3285 = vmatprep.mubr.msk.bf16.mxu0 %vm447_vm3, %v3406_v42  ;;  %v2088_v39 = vshrl.u32 %v4103_v55, 16  ;;  %v2067_v42 = vor.u32 %v2066_v18, %v4100_v62  ;;  %v2070_v11 = vshll.u32 %v3018_v15, 16  ;;  %v2077_v13 = vrot.slane %v2075_v43, 4  ;;  %v3025_v52 = vld [vmem:[%s3527_s30 + $0x3c] sm:$0xf] }
  0x7c   : > { %v2080_v49 = vrot.slane %v2078_v56, 5  ;;  %v2969_v2 = vcombine.low %v4080_v33, %v4111_v59  ;;  %v4125_v54 = vsel %vm3704_vm7, %v1641_v60, %v1642_v45  ;;  %v4129_v10 = vsel %vm3704_vm7, %v2962_v12, %v1646_v41  ;;  %v3410_v33 = vld [vmem:[%s3527_s30 + $0x48] sm:$0xff]   ;;  %v3024_v60 = vld [vmem:[%s3527_s30 + $0x38] sm:$0x1] }
  0x7d   : > { %v4140_v8 = vsel %vm3704_vm7, %v2963_v48, %v1653_v50  ;;  %v4144_v16 = vsel %vm3704_vm7, %v1655_v63, %v1656_v3  ;;  %v3065_v51 = vrot.slane %v3057_v53, 9  ;;  %v2058_v9 = vrot.slane %v2057_v7, 4  ;;  %v3059_v48 = vld [vmem:[%s3527_s30 + $0x30] sm:$0xe]  ;;  %v3411_v53 = vld [vmem:[%s3527_s30 + $0x54] sm:$0xff]  }
  0x7e   : > { %3244 = vmatmul.mubr.msk.bf16.gmra.mxu1 %vm447_vm3, %v3405_v6  ;;  %v2445_v6 = vrot.slane %v3018_v15, 5  ;;  %v2444_v25 = vrot.slane %v2442_v28, 4  ;;  %v4155_v37 = vrot.slane %v2084_v22, 5  ;;  %v2090_v14 = vrot.slane %v2088_v39, 4 }
  0x7f   : > { %3267 = vmatprep.mubr.msk.bf16.mxu1 %vm447_vm3, %v2965_v23  ;;  %v4136_v23 = vld [vmem:[%s3527_s30 + $0x2c] sm:$0x1]  ;;  %v2068_v58 = vrot.slane %v2067_v42, 4  ;;  %v2072_v41 = vrot.slane %v2070_v11, 5  ;;  %v2081_v29 = vor.u32 %v2080_v49, %v2077_v13  ;;  %v2108_v46 = vshll.u32 %v4148_v27, 16  ;;  %v3412_v11 = vld [vmem:[%s3527_s30 + $0x60] sm:$0xff]  }
  0x80   : > { %v2094_v34 = vshll.u32 %v4136_v23, 16  ;;  %v2112_v45 = vshrl.u32 %v4148_v27, 16  ;;  %v2972_v40 = vcombine.low %v4140_v8, %v4144_v16  ;;  %v2063_v50 = vsel %vm3568_vm4, %v2058_v9, %v4100_v62  ;;  %v4192_v62 = vld [vmem:[%s3527_s30 + $0x40] sm:$0xf] }
  0x81   : > { %v2091_v12 = vor.u32 %v2090_v14, %v4155_v37  ;;  %v2449_v5 = vrot.slane %v4103_v55, 5  ;;  %v2073_v47 = vsel %vm3568_vm4, %v2068_v58, %v2072_v41  ;;  %v2082_v18 = vrot.slane %v2081_v29, 4  ;;  %v3060_v29 = vld [vmem:[%s3527_s30 + $0x3c] sm:$0xe] }
  0x82   : > { %3286 = vmatmul.mubr.msk.bf16.vlgmr.msra.gmra.mxu0 %vm447_vm3, %v3407_v36  ;;  %v2102_v36 = vshll.u32 %v3022_v26, 16  ;;  %v2096_v43 = vrot.slane %v2094_v34, 5  ;;  %v3066_v56 = vrot.slane %v3058_v17, 9  ;;  %v4195_v15 = vrot.slane %v2108_v46, 5 }
  0x83   : > { %3320 = vmatpush3.bf16.msra.mxu0 %v2547_v1  ;;  %3289 = vmatprep.mubr.msk.bf16.mxu0 %vm447_vm3, %v3408_v4  ;;  %v4133_v1 = vsel %vm3704_vm7, %v1648_v35, %v1649_v44  ;;  %v4183_v4 = vsel %vm3704_vm7, %v2444_v25, %v2445_v6  ;;  %v2114_v59 = vrot.slane %v2112_v45, 4  ;;  %v2452_v55 = vrot.slane %v4136_v23, 5  ;;  %v3028_v6 = vld [vmem:[%s3527_s30 + $0x48] sm:$0xf] }
  0x84   : > { %v2971_v0 = vcombine.low %v4129_v10, %v4133_v1  ;;  %v2104_v44 = vrot.slane %v2102_v36, 5  ;;  %v2456_v63 = vrot.slane %v4148_v27, 5  ;;  %v2123_v3 = vshrl.u32 %v3025_v52, 16 }
  0x85   : > { %v2126_v7 = vshll.u32 %v3025_v52, 16  ;;  %v2451_v22 = vrot.slane %v2449_v5, 4  ;;  %v2132_v39 = vshll.u32 %v4192_v62, 16  ;;  %v2136_v42 = vshrl.u32 %v4192_v62, 16 }
  0x86   : > { %3268 = vmatmul.mubr.msk.bf16.vlgmr.msra.gmra.mxu1 %vm447_vm3, %v2966_v20  ;;  %v2099_v20 = vshrl.u32 %v3022_v26, 16  ;;  %v4209_v13 = vcombine.low %v2063_v50, %v2073_v47  ;;  %v2087_v24 = vsel %vm3568_vm4, %v2082_v18, %v4155_v37  ;;  %v4218_v19 = vsel %vm3704_vm7, %v3066_v56, %v2449_v5  ;;  %v4223_v26 = vld [vmem:[%s3527_s30 + $0x4c] sm:$0xf] }
  0x87   : > { %3302 = vmatpush3.bf16.msra.mxu1 %v4034_v61  ;;  %3271 = vmatprep.mubr.msk.bf16.mxu1 %vm447_vm3, %v2967_v38  ;;  %v2970_v61 = vcombine.low %v4096_v57, %v4125_v54  ;;  %v4175_v38 = vsel %vm3704_vm7, %v3065_v51, %v2442_v28  ;;  %v2092_v28 = vrot.slane %v2091_v12, 4  ;;  %v2115_v23 = vor.u32 %v2114_v59, %v4195_v15  ;;  %v3413_v47 = vld [vmem:[%s3527_s30 + $0x6c] sm:$0xff]  }
  0x88   : > { %v2101_v35 = vrot.slane %v2099_v20, 4  ;;  %v3074_v49 = vcombine.low %v4175_v38, %v4183_v4  ;;  %v3067_v51 = vrot.slane %v3059_v48, 9  ;;  %v2458_v27 = vrot.slane %v2456_v63, 4 }
  0x89   : > { %v2125_v9 = vrot.slane %v2123_v3, 4  ;;  %v2128_v25 = vrot.slane %v2126_v7, 5  ;;  %v2097_v37 = vsel %vm3568_vm4, %v2092_v28, %v2096_v43  ;;  %v4230_v14 = vsel %vm3704_vm7, %v2451_v22, %v2452_v55  ;;  %v3031_v55 = vld [vmem:[%s3527_s30 + $0x54] sm:$0xf] }
  0x8a   : > { %3290 = vmatmul.mubr.msk.bf16.gmra.mxu0 %vm447_vm3, %v3409_v31  ;;  %v2459_v31 = vrot.slane %v3024_v60, 5  ;;  %v4233_v58 = vrot.slane %v2132_v39, 5  ;;  %v2138_v41 = vrot.slane %v2136_v42, 4  ;;  %v2147_v34 = vshrl.u32 %v3028_v6, 16  ;;  %v3034_v42 = vld [vmem:[%s3527_s30 + $0x60] sm:$0xf] }
  0x8b   : > { %3293 = vmatprep.mubr.msk.bf16.mxu0 %vm447_vm3, %v3410_v33  ;;  %v3027_v33 = vld [vmem:[%s3527_s30 + $0x44] sm:$0x1]  ;;  %v2150_v17 = vshll.u32 %v3028_v6, 16  ;;  %v2156_v20 = vshll.u32 %v4223_v26, 16  ;;  %v2160_v36 = vshrl.u32 %v4223_v26, 16  ;;  %v4241_v45 = vrot.slane %v2115_v23, 4 }
  0x8c   : > { %v4247_v50 = vsel %vm3704_vm7, %v3067_v51, %v2456_v63  ;;  %v4251_v4 = vsel %vm3704_vm7, %v2458_v27, %v2459_v31  ;;  %v2129_v12 = vor.u32 %v2128_v25, %v2125_v9  ;;  %v2142_v5 = vshll.u32 %v3027_v33, 16  ;;  %v4296_v23 = vld [vmem:[%s3527_s30 + $0x64] sm:$0xf] }
  0x8d   : > { %v2463_v52 = vrot.slane %v4192_v62, 5  ;;  %v4259_v18 = vcombine.low %v2087_v24, %v2097_v37  ;;  %v3075_v43 = vcombine.low %v4218_v19, %v4230_v14  ;;  %v2139_v56 = vor.u32 %v2138_v41, %v4233_v58 }
  0x8e   : > { %3272 = vmatmul.mubr.msk.bf16.gmra.mxu1 %vm447_vm3, %v2968_v32  ;;  %v2105_v32 = vor.u32 %v2104_v44, %v2101_v35  ;;  %v3030_v35 = vld [vmem:[%s3527_s30 + $0x50] sm:$0x1]  ;;  %v2149_v57 = vrot.slane %v2147_v34, 4  ;;  %v2152_v54 = vrot.slane %v2150_v17, 5  ;;  %v2162_v62 = vrot.slane %v2160_v36, 4 }
  0x8f   : > { %3275 = vmatprep.mubr.msk.bf16.mxu1 %vm447_vm3, %v2969_v2  ;;  %v2118_v2 = vshll.u32 %v3024_v60, 16  ;;  %v3068_v60 = vrot.slane %v3060_v29, 9  ;;  %v3061_v44 = vld [vmem:[%s3527_s30 + $0x48] sm:$0xe]  ;;  %v3076_v1 = vcombine.low %v4247_v50, %v4251_v4  ;;  %v2130_v48 = vrot.slane %v2129_v12, 4 }
  0x90   : > { %v4239_v46 = vrot.slane %v2105_v32, 4  ;;  %v2144_v63 = vrot.slane %v2142_v5, 5  ;;  %v2465_v3 = vrot.slane %v2463_v52, 4  ;;  %v2466_v7 = vrot.slane %v3027_v33, 5  ;;  %v3033_v29 = vld [vmem:[%s3527_s30 + $0x5c] sm:$0x1] }
  0x91   : > { %v4243_v38 = vrot.slane %v2118_v2, 5  ;;  %v4290_v28 = vsel %vm3704_vm7, %v3068_v60, %v2463_v52  ;;  %v2166_v22 = vshll.u32 %v3030_v35, 16  ;;  %v3069_v39 = vrot.slane %v3061_v44, 9  ;;  %v3036_v12 = vld [vmem:[%s3527_s30 + $0x68] sm:$0x1] }
  0x92   : > { %3294 = vmatmul.mubr.msk.bf16.gmra.mxu0 %vm447_vm3, %v3411_v53  ;;  %v2111_v59 = vsel %vm3568_vm4, %v4239_v46, %v4195_v15  ;;  %v4285_v53 = vld [vmem:[%s3527_s30 + $0x58] sm:$0xf]  ;;  %v2140_v15 = vrot.slane %v2139_v56, 4  ;;  %v2473_v19 = vrot.slane %v3030_v35, 5  ;;  %v2171_v32 = vshrl.u32 %v3031_v55, 16 }
  0x93   : > { %3297 = vmatprep.mubr.msk.bf16.mxu0 %vm447_vm3, %v3412_v11  ;;  %v2121_v10 = vsel %vm3568_vm4, %v4241_v45, %v4243_v38  ;;  %v2153_v11 = vor.u32 %v2152_v54, %v2149_v57  ;;  %v2174_v51 = vshll.u32 %v3031_v55, 16  ;;  %v2180_v6 = vshll.u32 %v4285_v53, 16  ;;  %v3062_v46 = vld [vmem:[%s3527_s30 + $0x54] sm:$0xe]  ;;  %v3037_v57 = vld [vmem:[%s3527_s30 + $0x6c] sm:$0xf] }
  0x94   : > { %v2135_v27 = vsel %vm3568_vm4, %v2130_v48, %v4233_v58  ;;  %v2195_v31 = vshrl.u32 %v3034_v42, 16  ;;  %v2198_v9 = vshll.u32 %v3034_v42, 16  ;;  %v2145_v25 = vsel %vm3568_vm4, %v2140_v15, %v2144_v63 }
  0x95   : > { %v2168_v37 = vrot.slane %v2166_v22, 5  ;;  %v2204_v14 = vshll.u32 %v4296_v23, 16  ;;  %v2208_v33 = vshrl.u32 %v4296_v23, 16  ;;  %v2154_v58 = vrot.slane %v2153_v11, 4 }
  0x96   : > { %3276 = vmatmul.mubr.msk.bf16.gmra.mxu1 %vm447_vm3, %v2970_v61  ;;  %v4269_v61 = vrot.slane %v2156_v20, 5  ;;  %v2173_v16 = vrot.slane %v2171_v32, 4  ;;  %v2176_v34 = vrot.slane %v2174_v51, 5  ;;  %v4322_v17 = vrot.slane %v2180_v6, 5  ;;  %v3039_v6 = vld [vmem:[%s3527_s30 + $0x74] sm:$0x1] }
  0x97   : > { %3279 = vmatprep.mubr.msk.bf16.mxu1 %vm447_vm3, %v2971_v0  ;;  %v2470_v0 = vrot.slane %v4223_v26, 5  ;;  %v2184_v26 = vshrl.u32 %v4285_v53, 16  ;;  %v3043_v36 = vcombine.low %v2111_v59, %v2121_v10  ;;  %v2197_v45 = vrot.slane %v2195_v31, 4  ;;  %v3038_v10 = vld [vmem:[%s3527_s30 + $0x70] sm:$0xf] }
  0x98   : > { %v2163_v24 = vor.u32 %v2162_v62, %v4269_v61  ;;  %v2200_v38 = vrot.slane %v2198_v9, 5  ;;  %v3044_v50 = vcombine.low %v2135_v27, %v2145_v25  ;;  %v4330_v5 = vrot.slane %v2204_v14, 5  ;;  %v3064_v25 = vld [vmem:[%s3527_s30 + $0x6c] sm:$0xe] }
  0x99   : > { %v2472_v2 = vrot.slane %v2470_v0, 4  ;;  %v2471_v8 = vsel %vm3704_vm7, %v3069_v39, %v2470_v0  ;;  %v2186_v20 = vrot.slane %v2184_v26, 4  ;;  %v2210_v52 = vrot.slane %v2208_v33, 4 }
  0x9a   : > { %3298 = vmatmul.mubr.msk.bf16.gmra.mxu0 %vm447_vm3, %v3413_v47  ;;  %v2164_v41 = vrot.slane %v2163_v24, 4  ;;  %v2159_v47 = vsel %vm3568_vm4, %v2154_v58, %v4269_v61  ;;  %v2484_v35 = vrot.slane %v4296_v23, 5  ;;  %v2177_v54 = vor.u32 %v2176_v34, %v2173_v16 }
  0x9b   : > { %3321 = vmatprep.mubr.msk.bf16.mxu0 %vm447_vm3, %v3074_v49  ;;  %v4305_v49 = vsel %vm3704_vm7, %v2465_v3, %v2466_v7  ;;  %v2187_v62 = vor.u32 %v2186_v20, %v4322_v17  ;;  %v2190_v44 = vshll.u32 %v3033_v29, 16  ;;  %v3070_v59 = vrot.slane %v3062_v46, 9 }
  0x9c   : > { %v3077_v4 = vcombine.low %v4290_v28, %v4305_v49  ;;  %v2169_v56 = vsel %vm3568_vm4, %v2164_v41, %v2168_v37  ;;  %v2201_v55 = vor.u32 %v2200_v38, %v2197_v45  ;;  %v2214_v48 = vshll.u32 %v3036_v12, 16 }
  0x9d   : > { %v2211_v61 = vor.u32 %v2210_v52, %v4330_v5  ;;  %v2219_v3 = vshrl.u32 %v3037_v57, 16  ;;  %v2222_v7 = vshll.u32 %v3037_v57, 16  ;;  %v2487_v15 = vrot.slane %v3036_v12, 5 }
  0x9e   : > { %3280 = vmatmul.mubr.msk.bf16.gmra.mxu1 %vm447_vm3, %v2972_v40  ;;  %v2474_v40 = vsel %vm3704_vm7, %v2472_v2, %v2473_v19  ;;  %v2228_v28 = vshll.u32 %v3038_v10, 16  ;;  %v2232_v22 = vshrl.u32 %v3038_v10, 16  ;;  %v3045_v39 = vcombine.low %v2159_v47, %v2169_v56 }
  0x9f   : > { %3303 = vmatprep.mubr.msk.bf16.mxu1 %vm447_vm3, %v4209_v13  ;;  %v2477_v13 = vrot.slane %v4285_v53, 5  ;;  %v3078_v60 = vcombine.low %v2471_v8, %v2474_v40  ;;  %v2486_v53 = vrot.slane %v2484_v35, 4  ;;  %v2178_v42 = vrot.slane %v2177_v54, 4 }
  0xa0   : > { %v2188_v11 = vrot.slane %v2187_v62, 4  ;;  %v2192_v24 = vrot.slane %v2190_v44, 5  ;;  %v2202_v32 = vrot.slane %v2201_v55, 4  ;;  %v2216_v23 = vrot.slane %v2214_v48, 5 }
  0xa1   : > { %v2479_v0 = vrot.slane %v2477_v13, 4  ;;  %v2212_v2 = vrot.slane %v2211_v61, 4  ;;  %v2221_v26 = vrot.slane %v2219_v3, 4  ;;  %v2224_v27 = vrot.slane %v2222_v7, 5 }
  0xa2   : > { %3322 = vmatmul.mubr.msk.bf16.vlgmr.msra.gmra.mxu0 %vm447_vm3, %v3075_v43  ;;  %v3063_v43 = vld [vmem:[%s3527_s30 + $0x60] sm:$0xe]  ;;  %v2488_v49 = vsel %vm3704_vm7, %v2486_v53, %v2487_v15  ;;  %v2230_v31 = vrot.slane %v2228_v28, 5  ;;  %v2234_v9 = vrot.slane %v2232_v22, 4  ;;  %v2491_v37 = vrot.slane %v3038_v10, 5  ;;  %s4556_s30 = scalar_lea.vmem %s4654_s3, %s2810_s13 }
  0xa3   : > { %3325 = vmatprep.mubr.msk.bf16.mxu0 %vm447_vm3, %v3076_v1  ;;  %v2480_v1 = vrot.slane %v3033_v29, 5  ;;  %v3071_v63 = vrot.slane %v3063_v43, 9  ;;  %v2183_v14 = vsel %vm3568_vm4, %v2178_v42, %v4322_v17  ;;  %v2193_v33 = vsel %vm3568_vm4, %v2188_v11, %v2192_v24 }
  0xa4   : > { %v2207_v41 = vsel %vm3568_vm4, %v2202_v32, %v4330_v5  ;;  %v2217_v8 = vsel %vm3568_vm4, %v2212_v2, %v2216_v23  ;;  %v2238_v40 = vshll.u32 %v3039_v6, 16  ;;  %v3072_v29 = vrot.slane %v3064_v25, 9 }
  0xa5   : > { %v2481_v19 = vsel %vm3704_vm7, %v2479_v0, %v2480_v1  ;;  %v2485_v51 = vsel %vm3704_vm7, %v3071_v63, %v2484_v35  ;;  %v2225_v34 = vor.u32 %v2224_v27, %v2221_v26  ;;  %v2235_v17 = vor.u32 %v2234_v9, %v2230_v31 }
  0xa6   : > { %3304 = vmatmul.mubr.msk.bf16.vlgmr.msra.gmra.mxu1 %vm447_vm3, %v4259_v18  ;;  %v2478_v18 = vsel %vm3704_vm7, %v3070_v59, %v2477_v13  ;;  %v3080_v16 = vcombine.low %v2485_v51, %v2488_v49  ;;  %v2493_v20 = vrot.slane %v2491_v37, 4  ;;  %v3046_v46 = vcombine.low %v2183_v14, %v2193_v33 }
  0xa7   : > { %3307 = vmatprep.mubr.msk.bf16.mxu1 %vm447_vm3, %v3043_v36  ;;  %v3079_v58 = vcombine.low %v2478_v18, %v2481_v19  ;;  %v2494_v36 = vrot.slane %v3039_v6, 5  ;;  %v3047_v13 = vcombine.low %v2207_v41, %v2217_v8  ;;  %v2240_v45 = vrot.slane %v2238_v40, 5 }
  0xa8   : > { %v2226_v38 = vrot.slane %v2225_v34, 4 }
  0xa9   : > { %v2495_v12 = vsel %vm3704_vm7, %v2493_v20, %v2494_v36 }
  0xaa   : > { %3326 = vmatmul.mubr.msk.bf16.gmra.mxu0 %vm447_vm3, %v3077_v4  ;;  %v2492_v4 = vsel %vm3704_vm7, %v3072_v29, %v2491_v37  ;;  %v2231_v52 = vsel %vm3568_vm4, %v2226_v38, %v2230_v31 }
  0xab   : > { %3329 = vmatprep.mubr.msk.bf16.mxu0 %vm447_vm3, %v3078_v60  ;;  %v3081_v5 = vcombine.low %v2492_v4, %v2495_v12 }
  0xae   : > { %3308 = vmatmul.mubr.msk.bf16.gmra.mxu1 %vm447_vm3, %v3044_v50  ;;  %v2236_v50 = vrot.slane %v2235_v17, 4 }
  0xaf   : > { %3311 = vmatprep.mubr.msk.bf16.mxu1 %vm447_vm3, %v3045_v39 }
  0xb0   : > { %v2241_v47 = vsel %vm3568_vm4, %v2236_v50, %v2240_v45 }
  0xb1   : > { %v3048_v56 = vcombine.low %v2231_v52, %v2241_v47 }
  0xb2   : > { %3330 = vmatmul.mubr.msk.bf16.gmra.mxu0 %vm447_vm3, %v3079_v58 }
  0xb3   : > { %3333 = vmatprep.mubr.msk.bf16.mxu0 %vm447_vm3, %v3080_v16 }
  0xb6   : > { %3312 = vmatmul.mubr.msk.bf16.gmra.mxu1 %vm447_vm3, %v3046_v46 }
  0xb7   : > { %3315 = vmatprep.mubr.msk.bf16.mxu1 %vm447_vm3, %v3047_v13 }
  0xba   : > { %3334 = vmatmul.mubr.msk.bf16.gmra.mxu0 %vm447_vm3, %v3081_v5 }
  0xbe   : > { %3316 = vmatmul.mubr.msk.bf16.gmra.mxu1 %vm447_vm3, %v3048_v56 }
  0xe9   : > { %v3179_v60 = vpop.f32.mrf.mxu0 }
  0xeb   : > { %v510_v21 = vpop.f32.mrf.mxu0 }
  0xed   : > { %v3180_v57 = vpop.f32.mrf.mxu0 }
  0xee   : > { %v3187_v43 = vpop.f32.mrf.mxu1 }
  0xef   : > { %v513_v62 = vpop.f32.mrf.mxu0 }
  0xf0   : > { %v542_v35 = vpop.f32.mrf.mxu1 }
  0xf2   : > { %v3188_v54 = vpop.f32.mrf.mxu1 }
  0xf4   : > { %v545_v44 = vpop.f32.mrf.mxu1 }
  0xfa   : > { %v3183_v59 = vpop.f32.mrf.mxu0 }
  0xfc   : > { %v526_v10 = vpop.f32.mrf.mxu0 }
  0xfe   : > { %v3191_v0 = vpop.f32.mrf.mxu1  ;;  %v3184_v1 = vpop.f32.mrf.mxu0 }
 0x100   : > { %v558_v55 = vpop.f32.mrf.mxu1  ;;  %v529_v30 = vpop.f32.mrf.mxu0 }
 0x102   : > { %v3192_v48 = vpop.f32.mrf.mxu1  ;;  %v3215_v61 = vpop.f32.mrf.mxu0 }
 0x104   : > { %v4385_v63 = vpop.f32.mrf.mxu1  ;;  %v907_v3 = vpop.f32.mrf.mxu0 }
 0x106   : > { %v3197_v7 = vpop.f32.mrf.mxu1  ;;  %v3216_v53 = vpop.f32.mrf.mxu0 }
 0x107   : > { %v683_v15 = vadd.f32 %v3197_v7, %v3179_v60 }
 0x108   : > { %v674_v28 = vpop.f32.mrf.mxu1  ;;  %v910_v22 = vpop.f32.mrf.mxu0 }
 0x109   : > { %v4387_v39 = vadd.f32 %v3215_v61, %v683_v15  ;;  %v675_v42 = vadd.f32 %v674_v28, %v510_v21 }
 0x10a   : > { %v3198_v11 = vpop.f32.mrf.mxu1  ;;  %v3219_v24 = vpop.f32.mrf.mxu0 }
 0x10b   : > { %v4389_v18 = vadd.f32 %v907_v3, %v675_v42  ;;  %v686_v19 = vadd.f32 %v3198_v11, %v3180_v57 }
 0x10c   : > { %v677_v32 = vpop.f32.mrf.mxu1  ;;  %v923_v23 = vpop.f32.mrf.mxu0 }
 0x10d   : > { %v4391_v2 = vadd.f32 %v3216_v53, %v686_v19  ;;  %v678_v51 = vadd.f32 %v677_v32, %v513_v62 }
 0x10e   : > { %v3201_v6 = vpop.f32.mrf.mxu1  ;;  %v3220_v26 = vpop.f32.mrf.mxu0 }
 0x10f   : > { %v4393_v27 = vadd.f32 %v910_v22, %v678_v51  ;;  %v699_v49 = vadd.f32 %v3201_v6, %v3183_v59 }
 0x110   : > { %v690_v31 = vpop.f32.mrf.mxu1  ;;  %v926_v9 = vpop.f32.mrf.mxu0 }
 0x111   : > { %v4395_v25 = vadd.f32 %v3219_v24, %v699_v49  ;;  %v691_v37 = vadd.f32 %v690_v31, %v526_v10 }
 0x112   : > { %v3202_v14 = vpop.f32.mrf.mxu1  ;;  %v3223_v33 = vpop.f32.mrf.mxu0 }
 0x113   : > { %v4397_v58 = vadd.f32 %v923_v23, %v691_v37  ;;  %v702_v41 = vadd.f32 %v3202_v14, %v3184_v1 }
 0x114   : > { %v693_v8 = vpop.f32.mrf.mxu1  ;;  %v939_v16 = vpop.f32.mrf.mxu0 }
 0x115   : > { %v4399_v40 = vadd.f32 %v3220_v26, %v702_v41  ;;  %v694_v29 = vadd.f32 %v693_v8, %v529_v30 }
 0x116   : > { %v3205_v34 = vpop.f32.mrf.mxu1  ;;  %v3224_v17 = vpop.f32.mrf.mxu0 }
 0x117   : > { %v4401_v20 = vadd.f32 %v926_v9, %v694_v29  ;;  %v715_v36 = vadd.f32 %v3205_v34, %v3187_v43 }
 0x118   : > { %v706_v46 = vpop.f32.mrf.mxu1  ;;  %v942_v13 = vpop.f32.mrf.mxu0 }
 0x119   : > { %v4403_v45 = vadd.f32 %v3223_v33, %v715_v36  ;;  %v707_v38 = vadd.f32 %v706_v46, %v542_v35 }
 0x11a   : > { %v3206_v50 = vpop.f32.mrf.mxu1  ;;  %v3227_v4 = vpop.f32.mrf.mxu0 }
 0x11b   : > { %v4405_v12 = vadd.f32 %v939_v16, %v707_v38  ;;  %v718_v5 = vadd.f32 %v3206_v50, %v3188_v54 }
 0x11c   : > { %v709_v52 = vpop.f32.mrf.mxu1  ;;  %v955_v47 = vpop.f32.mrf.mxu0 }
 0x11d   : > { %v4407_v56 = vadd.f32 %v3224_v17, %v718_v5  ;;  %v710_v60 = vadd.f32 %v709_v52, %v545_v44 }
 0x11e   : > { %v3209_v21 = vpop.f32.mrf.mxu1  ;;  %v3228_v57 = vpop.f32.mrf.mxu0 }
 0x11f   : > { %v4409_v62 = vadd.f32 %v942_v13, %v710_v60  ;;  %v731_v43 = vadd.f32 %v3209_v21, %v3191_v0 }
 0x120   : > { %v722_v59 = vpop.f32.mrf.mxu1  ;;  %v958_v10 = vpop.f32.mrf.mxu0 }
 0x121   : > { %v4411_v1 = vadd.f32 %v3227_v4, %v731_v43  ;;  %v723_v35 = vadd.f32 %v722_v59, %v558_v55 }
 0x122   : > { %v3210_v30 = vpop.f32.mrf.mxu1  ;;  %v4413_v61 = vpop.f32.mrf.mxu0 }
 0x123   : > { %v4415_v3 = vadd.f32 %v955_v47, %v723_v35  ;;  %v734_v54 = vadd.f32 %v3210_v30, %v3192_v48 }
 0x124   : > { %v725_v7 = vpop.f32.mrf.mxu1  ;;  %v4417_v53 = vpop.f32.mrf.mxu0 }
 0x125   : > { %4659 = vst [vmem:[#allocation2_spill] sm:$0xff] %v4415_v3  ;;  %v4419_v44 = vadd.f32 %v3228_v57, %v734_v54  ;;  %v726_v15 = vadd.f32 %v725_v7, %v4385_v63 }
 0x126   : > { %v3233_v28 = vpop.f32.mrf.mxu1  ;;  %v4422_v0 = vpop.f32.mrf.mxu0 }
 0x127   : > { %4660 = vst [vmem:[#allocation3_spill] sm:$0xff] %v4419_v44  ;;  %v4424_v22 = vadd.f32 %v958_v10, %v726_v15 }
 0x128   : > { %v1109_v42 = vpop.f32.mrf.mxu1  ;;  %v4426_v55 = vpop.f32.mrf.mxu0 }
 0x129   : > { %4661 = vst [vmem:[#allocation4_spill] sm:$0xff] %v4424_v22  ;;  %v1172_v3 = vadd.f32 %v1109_v42, %v4389_v18 }
 0x12a   : > { %v3234_v11 = vpop.f32.mrf.mxu1  ;;  %v4428_v24 = vpop.f32.mrf.mxu0 }
 0x12c   : > { %v1112_v19 = vpop.f32.mrf.mxu1  ;;  %v4430_v48 = vpop.f32.mrf.mxu0 }
 0x12e   : > { %v4432_v32 = vpop.f32.mrf.mxu1  ;;  %v4434_v23 = vpop.f32.mrf.mxu0 }
 0x12f   : > { %v1178_v18 = vadd.f32 %v4432_v32, %v4395_v25 }
 0x130   : > { %v4436_v51 = vpop.f32.mrf.mxu1  ;;  %v4438_v63 = vpop.f32.mrf.mxu0 }
 0x132   : > { %v4440_v6 = vpop.f32.mrf.mxu1  ;;  %v4442_v26 = vpop.f32.mrf.mxu0 }
 0x133   : > { %v1179_v25 = vadd.f32 %v4440_v6, %v4399_v40 }
 0x134   : > { %v4444_v49 = vpop.f32.mrf.mxu1  ;;  %v4446_v31 = vpop.f32.mrf.mxu0 }
 0x136   : > { %v4448_v9 = vpop.f32.mrf.mxu1  ;;  %v4450_v37 = vpop.f32.mrf.mxu0 }
 0x138   : > { %v4452_v14 = vpop.f32.mrf.mxu1  ;;  %v4454_v33 = vpop.f32.mrf.mxu0 }
 0x139   : > { %4662 = vst [vmem:[#allocation5_spill] sm:$0xff] %v4454_v33 }
 0x13a   : > { %v4456_v41 = vpop.f32.mrf.mxu1  ;;  %v4458_v8 = vpop.f32.mrf.mxu0 }
 0x13b   : > { %4663 = vst [vmem:[#allocation6_spill] sm:$0xff] %v4458_v8 }
 0x13c   : > { %v4460_v16 = vpop.f32.mrf.mxu1  ;;  %v4462_v29 = vpop.f32.mrf.mxu0 }
 0x13d   : > { %4664 = vst [vmem:[#allocation7_spill] sm:$0xff] %v4462_v29 }
 0x13e   : > { %v4464_v34 = vpop.f32.mrf.mxu1  ;;  %v4466_v17 = vpop.f32.mrf.mxu0 }
 0x13f   : > { %4665 = vst [vmem:[#allocation8_spill] sm:$0xff] %v4466_v17 }
 0x140   : > { %v4468_v36 = vpop.f32.mrf.mxu1  ;;  %v4470_v46 = vpop.f32.mrf.mxu0 }
 0x141   : > { %4666 = vst [vmem:[#allocation9_spill] sm:$0xff] %v4468_v36  ;;  %4667 = vst [vmem:[#allocation10_spill] sm:$0xff] %v4470_v46 }
 0x142   : > { %v4472_v13 = vpop.f32.mrf.mxu1  ;;  %v3287_v38 = vpop.f32.mrf.mxu0 }
 0x143   : > { %4668 = vst [vmem:[#allocation11_spill] sm:$0xff] %v4472_v13 }
 0x144   : > { %v4474_v50 = vpop.f32.mrf.mxu1  ;;  %v1947_v4 = vpop.f32.mrf.mxu0 }
 0x145   : > { %4669 = vst [vmem:[#allocation12_spill] sm:$0xff] %v4474_v50 }
 0x146   : > { %v3269_v5 = vpop.f32.mrf.mxu1  ;;  %v4476_v52 = vpop.f32.mrf.mxu0 }
 0x148   : > { %v1745_v47 = vpop.f32.mrf.mxu1  ;;  %v4478_v60 = vpop.f32.mrf.mxu0 }
 0x14a   : > { %v3270_v21 = vpop.f32.mrf.mxu1  ;;  %v4480_v57 = vpop.f32.mrf.mxu0 }
 0x14c   : > { %v1748_v43 = vpop.f32.mrf.mxu1  ;;  %v4482_v59 = vpop.f32.mrf.mxu0 }
 0x14e   : > { %v3273_v10 = vpop.f32.mrf.mxu1  ;;  %v4484_v35 = vpop.f32.mrf.mxu0 }
 0x150   : > { %v1761_v30 = vpop.f32.mrf.mxu1  ;;  %v4486_v54 = vpop.f32.mrf.mxu0 }
 0x151   : > { %4670 = vst [vmem:[#allocation13_spill] sm:$0xff] %v4486_v54 }
 0x152   : > { %v4488_v7 = vpop.f32.mrf.mxu1  ;;  %v4490_v15 = vpop.f32.mrf.mxu0 }
 0x153   : > { %4671 = vst [vmem:[#allocation14_spill] sm:$0xff] %v4490_v15  ;;  %v1174_v15 = vadd.f32 %v3233_v28, %v4387_v39  ;;  %v1554_v39 = vadd.f32 %v4417_v53, %v1172_v3  ;;  %v1173_v28 = vadd.f32 %v1112_v19, %v4393_v27 }
 0x154   : > { %v4492_v46 = vpop.f32.mrf.mxu1  ;;  %v4494_v17 = vpop.f32.mrf.mxu0 }
 0x155   : > { %4672 = vst [vmem:[#allocation15_spill] sm:$0xff] %v4494_v17  ;;  %v1555_v27 = vadd.f32 %v4426_v55, %v1173_v28  ;;  %v4547_v55 = vld [vmem:[%s4653_s2] ss:$0 sm:$0xff] }
 0x156   : > { %v4496_v50 = vpop.f32.mrf.mxu1  ;;  %v4498_v22 = vpop.f32.mrf.mxu0 }
 0x157   : > { %4673 = vst [vmem:[#allocation16_spill] sm:$0xff] %v4498_v22 }
 0x158   : > { %v4501_v29 = vpop.f32.mrf.mxu1  ;;  %v4503_v13 = vpop.f32.mrf.mxu0 }
 0x159   : > { %4674 = vst [vmem:[#allocation17_spill] sm:$0xff] %v4503_v13  ;;  %v1556_v13 = vadd.f32 %v4413_v61, %v1174_v15 }
 0x15a   : > { %v4505_v44 = vpop.f32.mrf.mxu1  ;;  %v4507_v8 = vpop.f32.mrf.mxu0 }
 0x15b   : > { %4675 = vst [vmem:[#allocation18_spill] sm:$0xff] %v4505_v44  ;;  %4676 = vst [vmem:[#allocation19_spill] sm:$0xff] %v4507_v8  ;;  %v1175_v44 = vadd.f32 %v3234_v11, %v4391_v2  ;;  %v1808_v2 = vadd.f32 %v1745_v47, %v1554_v39  ;;  %v1176_v11 = vadd.f32 %v4436_v51, %v4397_v58 }
 0x15c   : > { %v4510_v36 = vpop.f32.mrf.mxu1  ;;  %v4512_v17 = vpop.f32.mrf.mxu0  ;;  %v1177_v51 = vadd.f32 %v4444_v49, %v4401_v20 }
 0x15d   : > { %4677 = vst [vmem:[#allocation20_spill] sm:$0xff] %v4512_v17  ;;  %v1810_v17 = vadd.f32 %v3269_v5, %v1556_v13  ;;  %v1557_v61 = vadd.f32 %v4422_v0, %v1175_v44  ;;  %v1560_v13 = vadd.f32 %v4428_v24, %v1178_v18  ;;  %v2010_v44 = vadd.f32 %v1947_v4, %v1808_v2 }
 0x15e   : > { %v4515_v22 = vpop.f32.mrf.mxu1  ;;  %v4517_v33 = vpop.f32.mrf.mxu0  ;;  %v1809_v0 = vadd.f32 %v1748_v43, %v1555_v27  ;;  %v1558_v58 = vadd.f32 %v4430_v48, %v1176_v11  ;;  %v1561_v4 = vadd.f32 %v4434_v23, %v1179_v25  ;;  %v1182_v48 = vadd.f32 %v4448_v9, %v4403_v45 }
 0x15f   : > { %4678 = vst [vmem:[#allocation21_spill] sm:$0xff] %v4517_v33  ;;  %v2012_v53 = vadd.f32 %v3287_v38, %v1810_v17  ;;  %v1811_v19 = vadd.f32 %v3270_v21, %v1557_v61  ;;  %v1814_v39 = vadd.f32 %v3273_v10, %v1560_v13  ;;  %v1559_v23 = vadd.f32 %v4438_v63, %v1177_v51  ;;  %v4680_v51 = vld [vmem:[#allocation5_spill] sm:$0xff] }
 0x160   : > { %v4521_v54 = vpop.f32.mrf.mxu1  ;;  %v4523_v8 = vpop.f32.mrf.mxu0  ;;  %v1812_v21 = vadd.f32 %v1761_v30, %v1558_v58  ;;  %v2011_v43 = vadd.f32 %v4478_v60, %v1809_v0  ;;  %v1180_v45 = vadd.f32 %v4452_v14, %v4405_v12  ;;  %v1815_v18 = vadd.f32 %v4488_v7, %v1561_v4 }
 0x161   : > { %v2013_v40 = vadd.f32 %v4476_v52, %v1811_v19  ;;  %v2016_v9 = vadd.f32 %v4480_v57, %v1814_v39  ;;  %v1564_v11 = vadd.f32 %v4442_v26, %v1182_v48  ;;  %v1183_v63 = vadd.f32 %v4456_v41, %v4407_v56 }
 0x162   : > { %v4530_v42 = vpop.f32.mrf.mxu1  ;;  %v3323_v33 = vpop.f32.mrf.mxu0  ;;  %v1813_v57 = vadd.f32 %v4492_v46, %v1559_v23  ;;  %v1562_v19 = vadd.f32 %v4446_v31, %v1180_v45  ;;  %v1181_v26 = vadd.f32 %v4460_v16, %v4409_v62  ;;  %v1186_v31 = vadd.f32 %v4464_v34, %v4411_v1 }
 0x163   : > { %v1818_v13 = vadd.f32 %v4496_v50, %v1564_v11  ;;  %v4679_v50 = vld [vmem:[#allocation13_spill] sm:$0xff]  ;;  %v4690_v11 = vld [vmem:[#allocation4_spill] sm:$0xff] }
 0x164   : > { %v4535_v15 = vpop.f32.mrf.mxu1  ;;  %v2583_v3 = vpop.f32.mrf.mxu0  ;;  %v2015_v0 = vadd.f32 %v4679_v50, %v1813_v57  ;;  %v1563_v39 = vadd.f32 %v4680_v51, %v1181_v26  ;;  %v4693_v26 = vld [vmem:[#allocation8_spill] sm:$0xff] }
 0x166   : > { %v3305_v32 = vpop.f32.mrf.mxu1  ;;  %v3324_v5 = vpop.f32.mrf.mxu0 }
 0x167   : > { %v2394_v47 = vadd.f32 %v3305_v32, %v2012_v53 }
 0x168   : > { %v2329_v24 = vpop.f32.mrf.mxu1  ;;  %v2586_v17 = vpop.f32.mrf.mxu0 }
 0x169   : > { %v2648_v6 = vadd.f32 %v3323_v33, %v2394_v47  ;;  %v2392_v38 = vadd.f32 %v2329_v24, %v2010_v44  ;;  %v1816_v44 = vadd.f32 %v4501_v29, %v1562_v19  ;;  %v4681_v24 = vld [vmem:[#allocation2_spill] sm:$0xff] }
 0x16a   : > { %v3306_v20 = vpop.f32.mrf.mxu1  ;;  %v3327_v49 = vpop.f32.mrf.mxu0  ;;  %v4684_v29 = vld [vmem:[#allocation18_spill] sm:$0xff] }
 0x16b   : > { %v2671_v52 = vadd.f32 %v4547_v55, %v2648_v6  ;;  %v2646_v33 = vadd.f32 %v2583_v3, %v2392_v38  ;;  %v2395_v10 = vadd.f32 %v3306_v20, %v2013_v40  ;;  %v2014_v3 = vadd.f32 %v4482_v59, %v1812_v21  ;;  %v4683_v40 = vld [vmem:[#allocation14_spill] sm:$0xff] }
 0x16c   : > { %v2332_v30 = vpop.f32.mrf.mxu1  ;;  %v2599_v28 = vpop.f32.mrf.mxu0  ;;  %v2017_v59 = vadd.f32 %v4484_v35, %v1815_v18  ;;  %v2020_v6 = vadd.f32 %v4683_v40, %v1818_v13  ;;  %v4685_v20 = vld [vmem:[#allocation6_spill] sm:$0xff] }
 0x16d   : > { %2687 = vst [vmem:[%s4556_s30 + $0x10] sm:$0xff] %v2671_v52  ;;  %v2669_v61 = vadd.f32 %v4547_v55, %v2646_v33  ;;  %v2649_v60 = vadd.f32 %v3324_v5, %v2395_v10  ;;  %v2393_v2 = vadd.f32 %v2332_v30, %v2011_v43  ;;  %v1565_v5 = vadd.f32 %v4450_v37, %v1183_v63  ;;  %v4686_v43 = vld [vmem:[#allocation3_spill] sm:$0xff]  ;;  %v4691_v63 = vld [vmem:[#allocation12_spill] sm:$0xff] }
 0x16e   : > { %v3309_v12 = vpop.f32.mrf.mxu1  ;;  %v3328_v14 = vpop.f32.mrf.mxu0  ;;  %v4687_v52 = vld [vmem:[#allocation11_spill] sm:$0xff]  ;;  %v1817_v30 = vadd.f32 %v4510_v36, %v1563_v39 }
 0x16f   : > { %2685 = vst [vmem:[%s4556_s30] sm:$0xff] %v2669_v61  ;;  %v2672_v7 = vadd.f32 %v4547_v55, %v2649_v60  ;;  %v2647_v27 = vadd.f32 %v2586_v17, %v2393_v2  ;;  %v2398_v53 = vadd.f32 %v3309_v12, %v2016_v9  ;;  %v4682_v17 = vld [vmem:[#allocation9_spill] sm:$0xff]  ;;  %v1819_v38 = vadd.f32 %v4684_v29, %v1565_v5  ;;  %v4688_v10 = vld [vmem:[#allocation15_spill] sm:$0xff] }
 0x170   : > { %v2345_v56 = vpop.f32.mrf.mxu1  ;;  %v2602_v41 = vpop.f32.mrf.mxu0  ;;  %v1184_v37 = vadd.f32 %v4682_v17, %v4681_v24  ;;  %v1187_v33 = vadd.f32 %v4687_v52, %v4686_v43  ;;  %v2018_v23 = vadd.f32 %v4688_v10, %v1816_v44  ;;  %v4689_v60 = vld [vmem:[#allocation7_spill] sm:$0xff] }
 0x171   : > { %2688 = vst [vmem:[%s4556_s30 + $0x18] sm:$0xff] %v2672_v7  ;;  %v2670_v46 = vadd.f32 %v4547_v55, %v2647_v27  ;;  %v2652_v25 = vadd.f32 %v3327_v49, %v2398_v53  ;;  %v2396_v32 = vadd.f32 %v2345_v56, %v2014_v3  ;;  %v1568_v49 = vadd.f32 %v4685_v20, %v1186_v31  ;;  %v4692_v7 = vld [vmem:[#allocation16_spill] sm:$0xff]  ;;  %v4695_v31 = vld [vmem:[#allocation10_spill] sm:$0xff] }
 0x172   : > { %v3310_v62 = vpop.f32.mrf.mxu1  ;;  %v3331_v16 = vpop.f32.mrf.mxu0  ;;  %v1566_v2 = vadd.f32 %v4689_v60, %v1184_v37  ;;  %v1185_v3 = vadd.f32 %v4691_v63, %v4690_v11  ;;  %v2021_v27 = vadd.f32 %v4692_v7, %v1819_v38  ;;  %v1569_v13 = vadd.f32 %v4693_v26, %v1187_v33 }
 0x173   : > { %2686 = vst [vmem:[%s4556_s30 + $0x8] sm:$0xff] %v2670_v46  ;;  %v2675_v35 = vadd.f32 %v4547_v55, %v2652_v25  ;;  %v2650_v47 = vadd.f32 %v2599_v28, %v2396_v32  ;;  %v2399_v58 = vadd.f32 %v3310_v62, %v2017_v59  ;;  %v1822_v12 = vadd.f32 %v4515_v22, %v1568_v49  ;;  %v4694_v46 = vld [vmem:[#allocation17_spill] sm:$0xff]  ;;  %v4696_v62 = vld [vmem:[#allocation19_spill] sm:$0xff] }
 0x174   : > { %v2348_v1 = vpop.f32.mrf.mxu1  ;;  %v2615_v34 = vpop.f32.mrf.mxu0  ;;  %v1820_v56 = vadd.f32 %v4521_v54, %v1566_v2  ;;  %v2019_v25 = vadd.f32 %v4694_v46, %v1817_v30  ;;  %v1567_v44 = vadd.f32 %v4695_v31, %v1185_v3 }
 0x175   : > { %2691 = vst [vmem:[%s4556_s30 + $0x30] sm:$0xff] %v2675_v35  ;;  %v2673_v4 = vadd.f32 %v4547_v55, %v2650_v47  ;;  %v2653_v48 = vadd.f32 %v3328_v14, %v2399_v58  ;;  %v2397_v21 = vadd.f32 %v2348_v1, %v2015_v0  ;;  %v2024_v50 = vadd.f32 %v4696_v62, %v1822_v12  ;;  %v4697_v58 = vld [vmem:[#allocation20_spill] sm:$0xff] }
 0x176   : > { %v3313_v45 = vpop.f32.mrf.mxu1  ;;  %v3332_v9 = vpop.f32.mrf.mxu0  ;;  %v1823_v0 = vadd.f32 %v4530_v42, %v1569_v13  ;;  %v2022_v51 = vadd.f32 %v4697_v58, %v1820_v56  ;;  %v1821_v17 = vadd.f32 %v4535_v15, %v1567_v44  ;;  %v4698_v42 = vld [vmem:[#allocation21_spill] sm:$0xff] }
 0x177   : > { %2689 = vst [vmem:[%s4556_s30 + $0x20] sm:$0xff] %v2673_v4  ;;  %v2676_v28 = vadd.f32 %v4547_v55, %v2653_v48  ;;  %v2651_v18 = vadd.f32 %v2602_v41, %v2397_v21  ;;  %v2402_v61 = vadd.f32 %v3313_v45, %v2020_v6 }
 0x178   : > { %v2361_v14 = vpop.f32.mrf.mxu1  ;;  %v2618_v57 = vpop.f32.mrf.mxu0  ;;  %v2023_v15 = vadd.f32 %v4523_v8, %v1821_v17 }
 0x179   : > { %2692 = vst [vmem:[%s4556_s30 + $0x38] sm:$0xff] %v2676_v28  ;;  %v2674_v36 = vadd.f32 %v4547_v55, %v2651_v18  ;;  %v2656_v53 = vadd.f32 %v3331_v16, %v2402_v61  ;;  %v2400_v19 = vadd.f32 %v2361_v14, %v2018_v23 }
 0x17a   : > { %v3314_v41 = vpop.f32.mrf.mxu1  ;;  %v3335_v59 = vpop.f32.mrf.mxu0 }
 0x17b   : > { %2690 = vst [vmem:[%s4556_s30 + $0x28] sm:$0xff] %v2674_v36  ;;  %v2679_v22 = vadd.f32 %v4547_v55, %v2656_v53  ;;  %v2654_v32 = vadd.f32 %v2615_v34, %v2400_v19  ;;  %v2403_v5 = vadd.f32 %v3314_v41, %v2021_v27  ;;  %v2025_v34 = vadd.f32 %v4698_v42, %v1823_v0 }
 0x17c   : > { %v2364_v16 = vpop.f32.mrf.mxu1  ;;  %v2631_v24 = vpop.f32.mrf.mxu0 }
 0x17d   : > { %2695 = vst [vmem:[%s4556_s30 + $0x50] sm:$0xff] %v2679_v22  ;;  %v2677_v54 = vadd.f32 %v4547_v55, %v2654_v32  ;;  %v2657_v35 = vadd.f32 %v3332_v9, %v2403_v5  ;;  %v2401_v47 = vadd.f32 %v2364_v16, %v2019_v25 }
 0x17e   : > { %v3317_v39 = vpop.f32.mrf.mxu1  ;;  %v3336_v21 = vpop.f32.mrf.mxu0 }
 0x17f   : > { %2693 = vst [vmem:[%s4556_s30 + $0x40] sm:$0xff] %v2677_v54  ;;  %v2680_v37 = vadd.f32 %v4547_v55, %v2657_v35  ;;  %v2655_v40 = vadd.f32 %v2618_v57, %v2401_v47  ;;  %v2406_v6 = vadd.f32 %v3317_v39, %v2024_v50 }
 0x180   : > { %v2377_v1 = vpop.f32.mrf.mxu1  ;;  %v2634_v45 = vpop.f32.mrf.mxu0 }
 0x181   : > { %2696 = vst [vmem:[%s4556_s30 + $0x58] sm:$0xff] %v2680_v37  ;;  %v2678_v29 = vadd.f32 %v4547_v55, %v2655_v40  ;;  %v2660_v38 = vadd.f32 %v3335_v59, %v2406_v6  ;;  %v2404_v4 = vadd.f32 %v2377_v1, %v2022_v51 }
 0x182   : > { %v3318_v48 = vpop.f32.mrf.mxu1 }
 0x183   : > { %2694 = vst [vmem:[%s4556_s30 + $0x48] sm:$0xff] %v2678_v29  ;;  %v2683_v20 = vadd.f32 %v4547_v55, %v2660_v38  ;;  %v2658_v49 = vadd.f32 %v2631_v24, %v2404_v4  ;;  %v2407_v43 = vadd.f32 %v3318_v48, %v2025_v34 }
 0x184   : > { %v2380_v52 = vpop.f32.mrf.mxu1 }
 0x185   : > { %2699 = vst [vmem:[%s4556_s30 + $0x70] sm:$0xff] %v2683_v20  ;;  %v2681_v33 = vadd.f32 %v4547_v55, %v2658_v49  ;;  %v2661_v10 = vadd.f32 %v3336_v21, %v2407_v43  ;;  %v2405_v23 = vadd.f32 %v2380_v52, %v2023_v15 }
 0x187   : > { %2697 = vst [vmem:[%s4556_s30 + $0x60] sm:$0xff] %v2681_v33  ;;  %v2684_v9 = vadd.f32 %v4547_v55, %v2661_v10  ;;  %v2659_v30 = vadd.f32 %v2634_v45, %v2405_v23 }
 0x189   : > { %2700 = vst [vmem:[%s4556_s30 + $0x78] sm:$0xff] %v2684_v9  ;;  %v2682_v8 = vadd.f32 %v4547_v55, %v2659_v30 }
 0x18b   : > { %2698 = vst [vmem:[%s4556_s30 + $0x68] sm:$0xff] %v2682_v8 }
 0x18c PF: > { %s13_s16 = sadd.s32 1, %s3452_s16   ;;  %s4699_s12 = smov %s3444_s14 }
 0x18d   : > { %p10_p7 = scmp.ge.s32.totalorder %s13_s16, 6   ;;  %s4700_s13 = smov %s3448_s15 }
 0x18e   : > { %s4701_s14 = smov %s4704_s17  ;;  %s4702_s15 = smov %s4708_s18 }
 0x18f   :  { %12 = sbr.rel (!%p10_p7) target bundleno = 3 (0x3), region = 73 }

</bundles_post_ra>
